<compile_context>
chip_gen: v7x
topology: tpu7x:2x2x1
jax: 0.10.0
libtpu: 0.0.40
codegen_flags: <defaults>
</compile_context>

<pallas_src>
import jax
import jax.numpy as jnp
from jax.experimental import pallas as pl
from jax.experimental.pallas import tpu as pltpu

# Module-default hyperparameters
DZ = 64               # channel_z
NUM_HEAD = 4          # num_head
DHC = 8               # dim_head
DC = NUM_HEAD * DHC   # 32
LN_EPS = 1e-5


def _attn_kernel(z_ref, wqkvg_ref, bqkvg_ref, wf_ref, bf_ref, out_ref):
    tb, col, dz = z_ref.shape
    n = tb * col

    # Flatten (tb, col) -> n rows: LayerNorm + projection are purely row-wise,
    # so do them on a 2-D (n, dz) slab (leading-dim merge, no lane relayout).
    z = z_ref[...].astype(jnp.float32).reshape(n, dz)

    # ---- LayerNorm statistics over channel_z (affine folded into the weights) ----
    mean = jnp.mean(z, axis=-1, keepdims=True)
    var = jnp.mean((z - mean) ** 2, axis=-1, keepdims=True)
    zn = (z - mean) * jax.lax.rsqrt(var + LN_EPS)               # (n, dz)

    # ---- fused Q|K|V|G projection: one (n,64)x(64,128) MXU matmul ----
    # gamma/beta and 1/sqrt(dim_head) are pre-folded into wqkvg/bqkvg.
    proj = jnp.dot(zn, wqkvg_ref[...],
                   preferred_element_type=jnp.float32) + bqkvg_ref[...]  # (n, 128)

    # one lane-dense sigmoid for all heads' gates
    gate = jax.nn.sigmoid(proj[:, 3 * DC:])                     # (n, 32)

    wf = wf_ref[...]                                            # (32, 64)
    acc = jnp.zeros((n, dz), jnp.float32)

    # Per-head attention, batched over the TB rows (single batch dim einsums).
    for h in range(NUM_HEAD):                                   # unrolled, 4 iters
        lo = h * DHC
        qh = proj[:, lo:lo + DHC].reshape(tb, col, DHC)                 # pre-scaled Q
        kh = proj[:, DC + lo:DC + lo + DHC].reshape(tb, col, DHC)
        vh = proj[:, 2 * DC + lo:2 * DC + lo + DHC].reshape(tb, col, DHC)

        # contract last dims (no materialized transpose)
        s = jnp.einsum('bic,bjc->bij', qh, kh,
                       preferred_element_type=jnp.float32)              # (tb,col,col)
        s = s - jnp.max(s, axis=-1, keepdims=True)
        e = jnp.exp(s)
        w = e * pl.reciprocal(jnp.sum(e, axis=-1, keepdims=True), approx=True)
        oh = jnp.einsum('bij,bjc->bic', w, vh,
                        preferred_element_type=jnp.float32)             # (tb,col,DHC)

        gated = oh.reshape(n, DHC) * gate[:, lo:lo + DHC]               # (n, DHC)
        # accumulate through the matching rows of W_final (avoids a lane concat)
        acc = acc + jnp.dot(gated, wf[lo:lo + DHC, :],
                            preferred_element_type=jnp.float32)

    out = acc + bf_ref[...]                                     # single bias add
    out_ref[...] = out.reshape(tb, col, dz).astype(out_ref.dtype)


def _choose_tb(bl, col):
    """Rows of (col, DZ) work per grid step: big enough to amortize per-step
    overhead, small enough to stay well inside a conservative scoped-VMEM budget
    (v7x-safe), keeping >= 2 grid steps so both v7x TensorCores get work."""
    # rough f32 bytes per (batch,row) row: z in/out double-buffered + proj + attn scratch
    bytes_per_row = 4 * col * (4 * DZ + 8 * DC + 2 * col)
    budget = 8 << 20
    tb = max(8, min(512, budget // max(bytes_per_row, 1)))
    tb = min(tb, bl)
    if bl >= 2 and -(-bl // tb) < 2:     # ensure at least 2 grid steps
        tb = -(-bl // 2)
    return max(int(tb), 1)


def inter_self_attention_s(z_inter, params):
    """z_inter: (B, row, col, DZ) float32. params: dict of weights (see init_params)."""
    B, row, col, dz = z_inter.shape
    assert dz == DZ
    BL = B * row
    zf = z_inter.reshape(BL, col, dz)

    # Fuse Q|K|V|gate weights/biases; fold 1/sqrt(dim_head) into the Q columns.
    scalar = 1.0 / float(DHC) ** 0.5
    w_qkvg = jnp.concatenate(
        [params["wq"] * scalar, params["wk"], params["wv"], params["wg"]], axis=1)  # (64,128)
    b_qkvg = jnp.concatenate(
        [params["bq"] * scalar, params["bk"], params["bv"], params["bg"]], axis=1)  # (1,128)
    # Fold the LayerNorm affine (gamma/beta) into the fused projection:
    #   (zn*g + b) @ W + bias = zn @ (g[:,None]*W) + (b @ W + bias)
    b_eff = params["ln_b"] @ w_qkvg + b_qkvg                                         # (1,128)
    w_eff = params["ln_g"].reshape(DZ, 1) * w_qkvg                                   # (64,128)

    tb = _choose_tb(BL, col)
    grid = -(-BL // tb)
    bl_pad = grid * tb
    if bl_pad != BL:
        zf = jnp.concatenate(
            [zf, jnp.zeros((bl_pad - BL, col, dz), zf.dtype)], axis=0)

    param_list = [w_eff, b_eff, params["wf"], params["bf"]]

    def _full_spec(p):
        nd = p.ndim
        return pl.BlockSpec(p.shape, lambda i, _nd=nd: (0,) * _nd)

    out = pl.pallas_call(
        _attn_kernel,
        out_shape=jax.ShapeDtypeStruct((bl_pad, col, dz), z_inter.dtype),
        grid_spec=pltpu.PrefetchScalarGridSpec(
            num_scalar_prefetch=0,
            grid=(grid,),
            in_specs=[pl.BlockSpec((tb, col, dz), lambda i: (i, 0, 0))]
                     + [_full_spec(p) for p in param_list],
            out_specs=pl.BlockSpec((tb, col, dz), lambda i: (i, 0, 0)),
        ),
        compiler_params=pltpu.CompilerParams(
            dimension_semantics=("parallel",),
            vmem_limit_bytes=32 * 1024 * 1024,
        ),
    )(zf, *param_list)
    return out[:BL].reshape(B, row, col, dz)


def init_params(key):
    """Deterministic synthetic parameters. Linear weights stored as (in, out)."""
    ks = jax.random.split(key, 10)

    def w(k, fan_in, fan_out):
        lim = 1.0 / jnp.sqrt(jnp.float32(fan_in))
        return jax.random.uniform(k, (fan_in, fan_out), jnp.float32, -lim, lim)

    def b(k, fan_in, fan_out):
        lim = 1.0 / jnp.sqrt(jnp.float32(fan_in))
        return jax.random.uniform(k, (1, fan_out), jnp.float32, -lim, lim)

    return {
        "ln_g": jnp.ones((1, DZ), jnp.float32),
        "ln_b": jnp.zeros((1, DZ), jnp.float32),
        "wq": w(ks[0], DZ, DC), "bq": b(ks[1], DZ, DC),
        "wk": w(ks[2], DZ, DC), "bk": b(ks[3], DZ, DC),
        "wv": w(ks[4], DZ, DC), "bv": b(ks[5], DZ, DC),
        "wg": w(ks[6], DZ, DC), "bg": b(ks[7], DZ, DC),
        "wf": w(ks[8], DC, DZ), "bf": b(ks[9], DC, DZ),
    }


def reference_jax(z, p):
    """Pure-JAX reference mirroring the PyTorch forward (bias=False, dist=None)."""
    mean = jnp.mean(z, axis=-1, keepdims=True)
    var = jnp.mean((z - mean) ** 2, axis=-1, keepdims=True)
    zn = (z - mean) / jnp.sqrt(var + LN_EPS) * p["ln_g"][0] + p["ln_b"][0]
    B, row, col, _ = z.shape
    rs = lambda x: x.reshape(B, row, col, NUM_HEAD, DHC)
    q = rs(zn @ p["wq"] + p["bq"][0])
    k = rs(zn @ p["wk"] + p["bk"][0])
    v = rs(zn @ p["wv"] + p["bv"][0])
    scalar = 1.0 / jnp.sqrt(jnp.float32(DHC))
    attn = jnp.einsum("blihc,bljhc->blihj", q * scalar, k)
    w = jax.nn.softmax(attn, axis=-1)
    v_avg = jnp.einsum("blihj,bljhc->blihc", w, v)
    gate = jax.nn.sigmoid(rs(zn @ p["wg"] + p["bg"][0]))
    z_com = (v_avg * gate).reshape(B, row, col, DC)
    return z_com @ p["wf"] + p["bf"][0]


if __name__ == "__main__":
    key = jax.random.PRNGKey(0)
    k_param, k_x = jax.random.split(key)
    params = init_params(k_param)

    B, row, col = 2, 4, 8
    z_inter = jax.random.normal(k_x, (B, row, col, DZ), jnp.float32)

    out = inter_self_attention_s(z_inter, params)
    out = jax.block_until_ready(out)

    ref = reference_jax(z_inter, params)
    assert out.shape == (B, row, col, DZ)
    # Tolerance 1e-3: the softmax denominator uses the EUP approximate
    # reciprocal (~2^-12 relative error); LN-affine folding changes rounding only.
    assert jnp.allclose(out, ref, atol=1e-3, rtol=1e-3), "mismatch vs pure-JAX reference"
    print("KERNEL_OK")
</pallas_src>

<mosaic_0001>
module attributes {stable_mosaic.version = 11 : i64} {
  func.func @_attn_kernel(%arg0: i32, %arg1: memref<4x8x64xf32, #tpu.memory_space<vmem>>, %arg2: memref<64x128xf32, #tpu.memory_space<vmem>>, %arg3: memref<1x128xf32, #tpu.memory_space<vmem>>, %arg4: memref<32x64xf32, #tpu.memory_space<vmem>>, %arg5: memref<1x64xf32, #tpu.memory_space<vmem>>, %arg6: memref<4x8x64xf32, #tpu.memory_space<vmem>>) attributes {dimension_semantics = [#tpu.dimension_semantics<parallel>], iteration_bounds = array<i64: 2>, scalar_prefetch = 0 : i64, scratch_operands = 0 : i64, tpu.core_type = #tpu.core_type<tc>, window_params = [{transform_indices = @transform_0, window_bounds = array<i64: 4, 8, 64>}, {pipeline_mode = #tpu.pipeline_mode<synchronous>, transform_indices = @transform_1, window_bounds = array<i64: 64, 128>}, {pipeline_mode = #tpu.pipeline_mode<synchronous>, transform_indices = @transform_2, window_bounds = array<i64: 1, 128>}, {pipeline_mode = #tpu.pipeline_mode<synchronous>, transform_indices = @transform_3, window_bounds = array<i64: 32, 64>}, {pipeline_mode = #tpu.pipeline_mode<synchronous>, transform_indices = @transform_4, window_bounds = array<i64: 1, 64>}, {transform_indices = @transform_5, window_bounds = array<i64: 4, 8, 64>}]} {
    %c0 = arith.constant 0 : index
    %c0_0 = arith.constant 0 : index
    %c0_1 = arith.constant 0 : index
    %0 = vector.load %arg1[%c0, %c0_0, %c0_1] : memref<4x8x64xf32, #tpu.memory_space<vmem>>, vector<4x8x64xf32>
    %1 = vector.shape_cast %0 : vector<4x8x64xf32> to vector<32x64xf32>
    %cst = arith.constant dense<0.000000e+00> : vector<32xf32>
    %2 = vector.multi_reduction <add>, %1, %cst [1] : vector<32x64xf32> to vector<32xf32>
    %3 = vector.shape_cast %2 : vector<32xf32> to vector<32x1xf32>
    %cst_2 = arith.constant 6.400000e+01 : f32
    %4 = vector.broadcast %cst_2 : f32 to vector<32x1xf32>
    %5 = arith.divf %3, %4 : vector<32x1xf32>
    %6 = vector.broadcast %5 : vector<32x1xf32> to vector<32x64xf32>
    %7 = arith.subf %1, %6 : vector<32x64xf32>
    %8 = arith.mulf %7, %7 : vector<32x64xf32>
    %cst_3 = arith.constant dense<0.000000e+00> : vector<32xf32>
    %9 = vector.multi_reduction <add>, %8, %cst_3 [1] : vector<32x64xf32> to vector<32xf32>
    %10 = vector.shape_cast %9 : vector<32xf32> to vector<32x1xf32>
    %cst_4 = arith.constant 6.400000e+01 : f32
    %11 = vector.broadcast %cst_4 : f32 to vector<32x1xf32>
    %12 = arith.divf %10, %11 : vector<32x1xf32>
    %13 = vector.broadcast %5 : vector<32x1xf32> to vector<32x64xf32>
    %14 = arith.subf %1, %13 : vector<32x64xf32>
    %cst_5 = arith.constant 9.99999974E-6 : f32
    %15 = vector.broadcast %cst_5 : f32 to vector<32x1xf32>
    %16 = arith.addf %12, %15 : vector<32x1xf32>
    %17 = math.rsqrt %16 : vector<32x1xf32>
    %18 = vector.broadcast %17 : vector<32x1xf32> to vector<32x64xf32>
    %19 = arith.mulf %14, %18 : vector<32x64xf32>
    %c0_6 = arith.constant 0 : index
    %c0_7 = arith.constant 0 : index
    %20 = vector.load %arg2[%c0_6, %c0_7] : memref<64x128xf32, #tpu.memory_space<vmem>>, vector<64x128xf32>
    %cst_8 = arith.constant dense<0.000000e+00> : vector<32x128xf32>
    %21 = tpu.matmul %19, %20, %cst_8 {dimension_numbers = #tpu.dot_dimension_numbers<[1], [0], [0], [1], [0, 0, 1, 1], [], []>} : vector<32x64xf32>, vector<64x128xf32>, vector<32x128xf32> -> vector<32x128xf32>
    %c0_9 = arith.constant 0 : index
    %c0_10 = arith.constant 0 : index
    %22 = vector.load %arg3[%c0_9, %c0_10] : memref<1x128xf32, #tpu.memory_space<vmem>>, vector<1x128xf32>
    %23 = vector.broadcast %22 : vector<1x128xf32> to vector<32x128xf32>
    %24 = arith.addf %21, %23 : vector<32x128xf32>
    %25 = vector.extract_strided_slice %24 {offsets = [0, 96], sizes = [32, 32], strides = [1, 1]} : vector<32x128xf32> to vector<32x32xf32>
    %26 = arith.negf %25 : vector<32x32xf32>
    %27 = math.exp %26 : vector<32x32xf32>
    %cst_11 = arith.constant 1.000000e+00 : f32
    %28 = vector.broadcast %cst_11 : f32 to vector<32x32xf32>
    %29 = arith.addf %28, %27 : vector<32x32xf32>
    %30 = arith.divf %28, %29 : vector<32x32xf32>
    %c0_12 = arith.constant 0 : index
    %c0_13 = arith.constant 0 : index
    %31 = vector.load %arg4[%c0_12, %c0_13] : memref<32x64xf32, #tpu.memory_space<vmem>>, vector<32x64xf32>
    %cst_14 = arith.constant 0.000000e+00 : f32
    %32 = vector.broadcast %cst_14 : f32 to vector<32x64xf32>
    %33 = vector.extract_strided_slice %24 {offsets = [0, 0], sizes = [32, 8], strides = [1, 1]} : vector<32x128xf32> to vector<32x8xf32>
    %34 = vector.shape_cast %33 : vector<32x8xf32> to vector<4x8x8xf32>
    %35 = vector.extract_strided_slice %24 {offsets = [0, 32], sizes = [32, 8], strides = [1, 1]} : vector<32x128xf32> to vector<32x8xf32>
    %36 = vector.shape_cast %35 : vector<32x8xf32> to vector<4x8x8xf32>
    %37 = vector.extract_strided_slice %24 {offsets = [0, 64], sizes = [32, 8], strides = [1, 1]} : vector<32x128xf32> to vector<32x8xf32>
    %38 = vector.shape_cast %37 : vector<32x8xf32> to vector<4x8x8xf32>
    "tpu.trace_start"() <{level = 10 : i32, message = "bic,bjc->bij"}> : () -> ()
    %cst_15 = arith.constant dense<0.000000e+00> : vector<4x8x8xf32>
    %39 = tpu.matmul %34, %36, %cst_15 {dimension_numbers = #tpu.dot_dimension_numbers<[2], [2], [1], [1], [0, 0, 0, 1, 1, 1], [0], [0]>} : vector<4x8x8xf32>, vector<4x8x8xf32>, vector<4x8x8xf32> -> vector<4x8x8xf32>
    "tpu.trace_stop"() : () -> ()
    %cst_16 = arith.constant dense<0xFF800000> : vector<4x8xf32>
    %40 = vector.multi_reduction <maximumf>, %39, %cst_16 [2] : vector<4x8x8xf32> to vector<4x8xf32>
    %41 = vector.shape_cast %40 : vector<4x8xf32> to vector<4x8x1xf32>
    %42 = vector.broadcast %41 : vector<4x8x1xf32> to vector<4x8x8xf32>
    %43 = arith.subf %39, %42 : vector<4x8x8xf32>
    %44 = math.exp %43 : vector<4x8x8xf32>
    %cst_17 = arith.constant dense<0.000000e+00> : vector<4x8xf32>
    %45 = vector.multi_reduction <add>, %44, %cst_17 [2] : vector<4x8x8xf32> to vector<4x8xf32>
    %46 = vector.shape_cast %45 : vector<4x8xf32> to vector<4x8x1xf32>
    %47 = tpu.reciprocal %46 {approx = true} : vector<4x8x1xf32> -> vector<4x8x1xf32>
    %48 = vector.broadcast %47 : vector<4x8x1xf32> to vector<4x8x8xf32>
    %49 = arith.mulf %44, %48 : vector<4x8x8xf32>
    "tpu.trace_start"() <{level = 10 : i32, message = "bij,bjc->bic"}> : () -> ()
    %cst_18 = arith.constant dense<0.000000e+00> : vector<4x8x8xf32>
    %50 = tpu.matmul %49, %38, %cst_18 {dimension_numbers = #tpu.dot_dimension_numbers<[2], [1], [1], [2], [0, 0, 0, 1, 1, 2], [0], [0]>} : vector<4x8x8xf32>, vector<4x8x8xf32>, vector<4x8x8xf32> -> vector<4x8x8xf32>
    "tpu.trace_stop"() : () -> ()
    %51 = vector.shape_cast %50 : vector<4x8x8xf32> to vector<32x8xf32>
    %52 = vector.extract_strided_slice %30 {offsets = [0, 0], sizes = [32, 8], strides = [1, 1]} : vector<32x32xf32> to vector<32x8xf32>
    %53 = arith.mulf %51, %52 : vector<32x8xf32>
    %54 = vector.extract_strided_slice %31 {offsets = [0, 0], sizes = [8, 64], strides = [1, 1]} : vector<32x64xf32> to vector<8x64xf32>
    %cst_19 = arith.constant dense<0.000000e+00> : vector<32x64xf32>
    %55 = tpu.matmul %53, %54, %cst_19 {dimension_numbers = #tpu.dot_dimension_numbers<[1], [0], [0], [1], [0, 0, 1, 1], [], []>} : vector<32x8xf32>, vector<8x64xf32>, vector<32x64xf32> -> vector<32x64xf32>
    %56 = arith.addf %32, %55 : vector<32x64xf32>
    %57 = vector.extract_strided_slice %24 {offsets = [0, 8], sizes = [32, 8], strides = [1, 1]} : vector<32x128xf32> to vector<32x8xf32>
    %58 = vector.shape_cast %57 : vector<32x8xf32> to vector<4x8x8xf32>
    %59 = vector.extract_strided_slice %24 {offsets = [0, 40], sizes = [32, 8], strides = [1, 1]} : vector<32x128xf32> to vector<32x8xf32>
    %60 = vector.shape_cast %59 : vector<32x8xf32> to vector<4x8x8xf32>
    %61 = vector.extract_strided_slice %24 {offsets = [0, 72], sizes = [32, 8], strides = [1, 1]} : vector<32x128xf32> to vector<32x8xf32>
    %62 = vector.shape_cast %61 : vector<32x8xf32> to vector<4x8x8xf32>
    "tpu.trace_start"() <{level = 10 : i32, message = "bic,bjc->bij"}> : () -> ()
    %cst_20 = arith.constant dense<0.000000e+00> : vector<4x8x8xf32>
    %63 = tpu.matmul %58, %60, %cst_20 {dimension_numbers = #tpu.dot_dimension_numbers<[2], [2], [1], [1], [0, 0, 0, 1, 1, 1], [0], [0]>} : vector<4x8x8xf32>, vector<4x8x8xf32>, vector<4x8x8xf32> -> vector<4x8x8xf32>
    "tpu.trace_stop"() : () -> ()
    %cst_21 = arith.constant dense<0xFF800000> : vector<4x8xf32>
    %64 = vector.multi_reduction <maximumf>, %63, %cst_21 [2] : vector<4x8x8xf32> to vector<4x8xf32>
    %65 = vector.shape_cast %64 : vector<4x8xf32> to vector<4x8x1xf32>
    %66 = vector.broadcast %65 : vector<4x8x1xf32> to vector<4x8x8xf32>
    %67 = arith.subf %63, %66 : vector<4x8x8xf32>
    %68 = math.exp %67 : vector<4x8x8xf32>
    %cst_22 = arith.constant dense<0.000000e+00> : vector<4x8xf32>
    %69 = vector.multi_reduction <add>, %68, %cst_22 [2] : vector<4x8x8xf32> to vector<4x8xf32>
    %70 = vector.shape_cast %69 : vector<4x8xf32> to vector<4x8x1xf32>
    %71 = tpu.reciprocal %70 {approx = true} : vector<4x8x1xf32> -> vector<4x8x1xf32>
    %72 = vector.broadcast %71 : vector<4x8x1xf32> to vector<4x8x8xf32>
    %73 = arith.mulf %68, %72 : vector<4x8x8xf32>
    "tpu.trace_start"() <{level = 10 : i32, message = "bij,bjc->bic"}> : () -> ()
    %cst_23 = arith.constant dense<0.000000e+00> : vector<4x8x8xf32>
    %74 = tpu.matmul %73, %62, %cst_23 {dimension_numbers = #tpu.dot_dimension_numbers<[2], [1], [1], [2], [0, 0, 0, 1, 1, 2], [0], [0]>} : vector<4x8x8xf32>, vector<4x8x8xf32>, vector<4x8x8xf32> -> vector<4x8x8xf32>
    "tpu.trace_stop"() : () -> ()
    %75 = vector.shape_cast %74 : vector<4x8x8xf32> to vector<32x8xf32>
    %76 = vector.extract_strided_slice %30 {offsets = [0, 8], sizes = [32, 8], strides = [1, 1]} : vector<32x32xf32> to vector<32x8xf32>
    %77 = arith.mulf %75, %76 : vector<32x8xf32>
    %78 = vector.extract_strided_slice %31 {offsets = [8, 0], sizes = [8, 64], strides = [1, 1]} : vector<32x64xf32> to vector<8x64xf32>
    %cst_24 = arith.constant dense<0.000000e+00> : vector<32x64xf32>
    %79 = tpu.matmul %77, %78, %cst_24 {dimension_numbers = #tpu.dot_dimension_numbers<[1], [0], [0], [1], [0, 0, 1, 1], [], []>} : vector<32x8xf32>, vector<8x64xf32>, vector<32x64xf32> -> vector<32x64xf32>
    %80 = arith.addf %56, %79 : vector<32x64xf32>
    %81 = vector.extract_strided_slice %24 {offsets = [0, 16], sizes = [32, 8], strides = [1, 1]} : vector<32x128xf32> to vector<32x8xf32>
    %82 = vector.shape_cast %81 : vector<32x8xf32> to vector<4x8x8xf32>
    %83 = vector.extract_strided_slice %24 {offsets = [0, 48], sizes = [32, 8], strides = [1, 1]} : vector<32x128xf32> to vector<32x8xf32>
    %84 = vector.shape_cast %83 : vector<32x8xf32> to vector<4x8x8xf32>
    %85 = vector.extract_strided_slice %24 {offsets = [0, 80], sizes = [32, 8], strides = [1, 1]} : vector<32x128xf32> to vector<32x8xf32>
    %86 = vector.shape_cast %85 : vector<32x8xf32> to vector<4x8x8xf32>
    "tpu.trace_start"() <{level = 10 : i32, message = "bic,bjc->bij"}> : () -> ()
    %cst_25 = arith.constant dense<0.000000e+00> : vector<4x8x8xf32>
    %87 = tpu.matmul %82, %84, %cst_25 {dimension_numbers = #tpu.dot_dimension_numbers<[2], [2], [1], [1], [0, 0, 0, 1, 1, 1], [0], [0]>} : vector<4x8x8xf32>, vector<4x8x8xf32>, vector<4x8x8xf32> -> vector<4x8x8xf32>
    "tpu.trace_stop"() : () -> ()
    %cst_26 = arith.constant dense<0xFF800000> : vector<4x8xf32>
    %88 = vector.multi_reduction <maximumf>, %87, %cst_26 [2] : vector<4x8x8xf32> to vector<4x8xf32>
    %89 = vector.shape_cast %88 : vector<4x8xf32> to vector<4x8x1xf32>
    %90 = vector.broadcast %89 : vector<4x8x1xf32> to vector<4x8x8xf32>
    %91 = arith.subf %87, %90 : vector<4x8x8xf32>
    %92 = math.exp %91 : vector<4x8x8xf32>
    %cst_27 = arith.constant dense<0.000000e+00> : vector<4x8xf32>
    %93 = vector.multi_reduction <add>, %92, %cst_27 [2] : vector<4x8x8xf32> to vector<4x8xf32>
    %94 = vector.shape_cast %93 : vector<4x8xf32> to vector<4x8x1xf32>
    %95 = tpu.reciprocal %94 {approx = true} : vector<4x8x1xf32> -> vector<4x8x1xf32>
    %96 = vector.broadcast %95 : vector<4x8x1xf32> to vector<4x8x8xf32>
    %97 = arith.mulf %92, %96 : vector<4x8x8xf32>
    "tpu.trace_start"() <{level = 10 : i32, message = "bij,bjc->bic"}> : () -> ()
    %cst_28 = arith.constant dense<0.000000e+00> : vector<4x8x8xf32>
    %98 = tpu.matmul %97, %86, %cst_28 {dimension_numbers = #tpu.dot_dimension_numbers<[2], [1], [1], [2], [0, 0, 0, 1, 1, 2], [0], [0]>} : vector<4x8x8xf32>, vector<4x8x8xf32>, vector<4x8x8xf32> -> vector<4x8x8xf32>
    "tpu.trace_stop"() : () -> ()
    %99 = vector.shape_cast %98 : vector<4x8x8xf32> to vector<32x8xf32>
    %100 = vector.extract_strided_slice %30 {offsets = [0, 16], sizes = [32, 8], strides = [1, 1]} : vector<32x32xf32> to vector<32x8xf32>
    %101 = arith.mulf %99, %100 : vector<32x8xf32>
    %102 = vector.extract_strided_slice %31 {offsets = [16, 0], sizes = [8, 64], strides = [1, 1]} : vector<32x64xf32> to vector<8x64xf32>
    %cst_29 = arith.constant dense<0.000000e+00> : vector<32x64xf32>
    %103 = tpu.matmul %101, %102, %cst_29 {dimension_numbers = #tpu.dot_dimension_numbers<[1], [0], [0], [1], [0, 0, 1, 1], [], []>} : vector<32x8xf32>, vector<8x64xf32>, vector<32x64xf32> -> vector<32x64xf32>
    %104 = arith.addf %80, %103 : vector<32x64xf32>
    %105 = vector.extract_strided_slice %24 {offsets = [0, 24], sizes = [32, 8], strides = [1, 1]} : vector<32x128xf32> to vector<32x8xf32>
    %106 = vector.shape_cast %105 : vector<32x8xf32> to vector<4x8x8xf32>
    %107 = vector.extract_strided_slice %24 {offsets = [0, 56], sizes = [32, 8], strides = [1, 1]} : vector<32x128xf32> to vector<32x8xf32>
    %108 = vector.shape_cast %107 : vector<32x8xf32> to vector<4x8x8xf32>
    %109 = vector.extract_strided_slice %24 {offsets = [0, 88], sizes = [32, 8], strides = [1, 1]} : vector<32x128xf32> to vector<32x8xf32>
    %110 = vector.shape_cast %109 : vector<32x8xf32> to vector<4x8x8xf32>
    "tpu.trace_start"() <{level = 10 : i32, message = "bic,bjc->bij"}> : () -> ()
    %cst_30 = arith.constant dense<0.000000e+00> : vector<4x8x8xf32>
    %111 = tpu.matmul %106, %108, %cst_30 {dimension_numbers = #tpu.dot_dimension_numbers<[2], [2], [1], [1], [0, 0, 0, 1, 1, 1], [0], [0]>} : vector<4x8x8xf32>, vector<4x8x8xf32>, vector<4x8x8xf32> -> vector<4x8x8xf32>
    "tpu.trace_stop"() : () -> ()
    %cst_31 = arith.constant dense<0xFF800000> : vector<4x8xf32>
    %112 = vector.multi_reduction <maximumf>, %111, %cst_31 [2] : vector<4x8x8xf32> to vector<4x8xf32>
    %113 = vector.shape_cast %112 : vector<4x8xf32> to vector<4x8x1xf32>
    %114 = vector.broadcast %113 : vector<4x8x1xf32> to vector<4x8x8xf32>
    %115 = arith.subf %111, %114 : vector<4x8x8xf32>
    %116 = math.exp %115 : vector<4x8x8xf32>
    %cst_32 = arith.constant dense<0.000000e+00> : vector<4x8xf32>
    %117 = vector.multi_reduction <add>, %116, %cst_32 [2] : vector<4x8x8xf32> to vector<4x8xf32>
    %118 = vector.shape_cast %117 : vector<4x8xf32> to vector<4x8x1xf32>
    %119 = tpu.reciprocal %118 {approx = true} : vector<4x8x1xf32> -> vector<4x8x1xf32>
    %120 = vector.broadcast %119 : vector<4x8x1xf32> to vector<4x8x8xf32>
    %121 = arith.mulf %116, %120 : vector<4x8x8xf32>
    "tpu.trace_start"() <{level = 10 : i32, message = "bij,bjc->bic"}> : () -> ()
    %cst_33 = arith.constant dense<0.000000e+00> : vector<4x8x8xf32>
    %122 = tpu.matmul %121, %110, %cst_33 {dimension_numbers = #tpu.dot_dimension_numbers<[2], [1], [1], [2], [0, 0, 0, 1, 1, 2], [0], [0]>} : vector<4x8x8xf32>, vector<4x8x8xf32>, vector<4x8x8xf32> -> vector<4x8x8xf32>
    "tpu.trace_stop"() : () -> ()
    %123 = vector.shape_cast %122 : vector<4x8x8xf32> to vector<32x8xf32>
    %124 = vector.extract_strided_slice %30 {offsets = [0, 24], sizes = [32, 8], strides = [1, 1]} : vector<32x32xf32> to vector<32x8xf32>
    %125 = arith.mulf %123, %124 : vector<32x8xf32>
    %126 = vector.extract_strided_slice %31 {offsets = [24, 0], sizes = [8, 64], strides = [1, 1]} : vector<32x64xf32> to vector<8x64xf32>
    %cst_34 = arith.constant dense<0.000000e+00> : vector<32x64xf32>
    %127 = tpu.matmul %125, %126, %cst_34 {dimension_numbers = #tpu.dot_dimension_numbers<[1], [0], [0], [1], [0, 0, 1, 1], [], []>} : vector<32x8xf32>, vector<8x64xf32>, vector<32x64xf32> -> vector<32x64xf32>
    %128 = arith.addf %104, %127 : vector<32x64xf32>
    %c0_35 = arith.constant 0 : index
    %c0_36 = arith.constant 0 : index
    %129 = vector.load %arg5[%c0_35, %c0_36] : memref<1x64xf32, #tpu.memory_space<vmem>>, vector<1x64xf32>
    %130 = vector.broadcast %129 : vector<1x64xf32> to vector<32x64xf32>
    %131 = arith.addf %128, %130 : vector<32x64xf32>
    %132 = vector.shape_cast %131 : vector<32x64xf32> to vector<4x8x64xf32>
    %c0_37 = arith.constant 0 : index
    %c0_38 = arith.constant 0 : index
    %c0_39 = arith.constant 0 : index
    %133 = vector.load %arg6[%c0_37, %c0_38, %c0_39] : memref<4x8x64xf32, #tpu.memory_space<vmem>>, vector<4x8x64xf32>
    tpu.vector_store %arg6[%c0_37, %c0_38, %c0_39], %132 {strides = array<i32>} : memref<4x8x64xf32, #tpu.memory_space<vmem>>, vector<4x8x64xf32>,
    return
  }
  func.func @transform_0(%arg0: i32) -> (i32, i32, i32) {
    %c0_i32 = arith.constant 0 : i32
    %c0_i32_0 = arith.constant 0 : i32
    %c0_i32_1 = arith.constant 0 : i32
    return %arg0, %c0_i32, %c0_i32_0 : i32, i32, i32
  }
  func.func @transform_1(%arg0: i32) -> (i32, i32) {
    %c0_i32 = arith.constant 0 : i32
    %c0_i32_0 = arith.constant 0 : i32
    %c0_i32_1 = arith.constant 0 : i32
    return %c0_i32, %c0_i32_0 : i32, i32
  }
  func.func @transform_2(%arg0: i32) -> (i32, i32) {
    %c0_i32 = arith.constant 0 : i32
    %c0_i32_0 = arith.constant 0 : i32
    %c0_i32_1 = arith.constant 0 : i32
    return %c0_i32, %c0_i32_0 : i32, i32
  }
  func.func @transform_3(%arg0: i32) -> (i32, i32) {
    %c0_i32 = arith.constant 0 : i32
    %c0_i32_0 = arith.constant 0 : i32
    %c0_i32_1 = arith.constant 0 : i32
    return %c0_i32, %c0_i32_0 : i32, i32
  }
  func.func @transform_4(%arg0: i32) -> (i32, i32) {
    %c0_i32 = arith.constant 0 : i32
    %c0_i32_0 = arith.constant 0 : i32
    %c0_i32_1 = arith.constant 0 : i32
    return %c0_i32, %c0_i32_0 : i32, i32
  }
  func.func @transform_5(%arg0: i32) -> (i32, i32, i32) {
    %c0_i32 = arith.constant 0 : i32
    %c0_i32_0 = arith.constant 0 : i32
    %c0_i32_1 = arith.constant 0 : i32
    return %arg0, %c0_i32, %c0_i32_0 : i32, i32, i32
  }
}

</mosaic_0001>

<bundles_post_ra>
// kernel: tpu_custom_call.1
= control target key start
LH: loop header
LB: loop body
LE: loop exit
PB: predicated region body
PF: predicated region fallthrough
CT: control target
= control target key end

     0   :  { %10 = vsyncpa [#allocation3], 0  ;;  %s5133_s0 = inlined_call_operand.hbm [shape: f32[8,8,64], index: 0, kind: input, shape index: {}]   ;;  %s5134_s1 = inlined_call_operand.hbm [shape: f32[64,128], index: 1, kind: input, shape index: {}]   ;;  %s5135_s2 = inlined_call_operand.vmem [shape: f32[1,128], index: 2, kind: input, shape index: {}]   ;;  %s5136_s3 = inlined_call_operand.hbm [shape: f32[32,64], index: 3, kind: input, shape index: {}]   ;;  %s5137_s4 = inlined_call_operand.vmem [shape: f32[1,64], index: 4, kind: input, shape index: {}]   ;;  %s5138_s5 = inlined_call_operand.hbm [shape: f32[8,8,64], index: 5, kind: output, shape index: {}]  }
   0x1   :  { %12 = vsyncpa [#allocation3 + $0x1], 0 }
   0x2   :  { %13 = vsyncpa [#allocation6], 0 }
   0x3   :  { %14 = vsyncpa [#allocation4], 0 }
   0x4   :  { %16 = vsyncpa [#allocation4 + $0x1], 0  ;;  %s4513_s18 = smov 0   ;;  %s4515_s19 = smov 0  }
   0x5   :  { %s4517_s20 = smov 0   ;;  %s4519_s21 = smov 0  }
   0x6 LB: > { %s4534_s22 = sadd.s32 4294967295, %s4457_s21   ;;  %s3694_s23 = sadd.s32 4294967294, %s4457_s21   ;;  %s4457_s21 = sphi %s4519_s21, %s5158_s21   ;;  %s4453_s20 = sphi %s4517_s20, %s5157_s20   ;;  %s4449_s19 = sphi %s4515_s19, %s5156_s19   ;;  %s4445_s18 = sphi %s4513_s18, %s5155_s18  }
   0x7   : > { %p42_p0 = scmp.ne.s32.totalorder %s4449_s19, %s4445_s18  ;;  %p5139_p1 = scmp.eq.s32.totalorder %s4534_s22, 0 }
   0x8   : > { %p156_p3 = scmp.eq.s32.totalorder %s3694_s23, 1  ;;  %p3695_p5 = scmp.ge.s32.totalorder %s4457_s21, 1 }
   0x9   : > { %p4543_p4 = por %p5139_p1, %p42_p0  ;;  %p163_p7 = scmp.lt.s32.totalorder %s4457_s21, 3 }
   0xa   : > { %p4548_p6 = por %p156_p3, %p42_p0  ;;  %s4459_s27 = smov [#allocation5]  }
   0xb   : > { %s5142_s24 = scalar_select %p4543_p4, 1, 0 }
   0xc   : > { %s5143_s25 = scalar_select %p4548_p6, 1, 0 }
   0xd   : > { %p4553_p8 = pnand %p3695_p5, %p163_p7  ;;  %s175_s28 = sshll.u32 %s4459_s27, 4  ;;  %s4557_s28 = int_to_ptr.vmem [resolvable:$true] %s175_s28 }
   0xe   : > { %s4460_s30 = smov [#allocation7]   ;;  %s4301_s9 = scalar_lea.hbm %s5134_s1, 1024 }
   0xf   : > { %p4138_p9 = pneg %p4553_p8  ;;  %s191_s6 = sshll.u32 %s4460_s30, 4  ;;  %s4568_s6 = int_to_ptr.vmem [resolvable:$true] %s191_s6 }
  0x10   : > { %p4302_p12 = scmp.ne.s32.totalorder %s5134_s1, %s4301_s9  ;;  %p4308_p5 = scmp.lt.u32.totalorder %s4301_s9, %s5134_s1 }
  0x11   : > { %p4564_p11 = pnand %p4138_p9, %p5139_p1 }
  0x13   : > { %p4303_p13 = pneg %p4564_p11 }
  0x15   : > { %p4304_p0 = pnand %p4303_p13, %p4302_p12 }
  0x17   : > { %p4305_p3 = pneg %p4304_p0 }
  0x19   : > { %p4310_p7 = pnand %p4308_p5, %p4305_p3 }
  0x1b   : > { %4313 = shalt.err (!%p4310_p7)
}
  0x1c   : > { %s4314_s14 = scalar_lea.vmem %s4557_s28, 1024  ;;  %p4322_p2 = scmp.lt.s32.totalorder %s4557_s28, %s4557_s28 }
  0x1d   : > { %p4315_p9 = scmp.ne.s32.totalorder %s4557_s28, %s4314_s14  ;;  %p4323_p12 = scmp.lt.s32.totalorder %s4314_s14, %s4314_s14 }
  0x1f   : > { %p4317_p10 = pnand %p4315_p9, %p4303_p13  ;;  %p4324_p0 = por %p4323_p12, %p4322_p2 }
  0x21   : > { %p4318_p1 = pneg %p4317_p10 }
  0x23   : > { %p4325_p6 = pnand %p4324_p0, %p4318_p1 }
  0x25   : > { %4328 = shalt.err (!%p4325_p6)
}
  0x26   : > { %s4461_s15 = smov 128   ;;  %s4462_s16 = smov 8  }
  0x27   : > { %4141 = dma.hbm_to_vmem [thread:$0]  (!%p4564_p11), %s5134_s1, 1024, %s4557_s28, [#allocation6], %s4461_s15, %s4461_s15, %s4462_s16  }
  0x28   : > { %s4329_s7 = scalar_lea.hbm %s5136_s3, 512 }
  0x29   : > { %p4330_p1 = scmp.ne.s32.totalorder %s5136_s3, %s4329_s7  ;;  %p4336_p10 = scmp.lt.u32.totalorder %s4329_s7, %s5136_s3 }
  0x2b   : > { %p4332_p2 = pnand %p4330_p1, %p4303_p13 }
  0x2d   : > { %p4333_p6 = pneg %p4332_p2 }
  0x2f   : > { %p4338_p3 = pnand %p4336_p10, %p4333_p6 }
  0x31   : > { %4341 = shalt.err (!%p4338_p3)
}
  0x32   : > { %s4342_s28 = scalar_lea.vmem %s4568_s6, 512  ;;  %p4350_p12 = scmp.lt.s32.totalorder %s4568_s6, %s4568_s6 }
  0x33   : > { %p4343_p5 = scmp.ne.s32.totalorder %s4568_s6, %s4342_s28  ;;  %p4351_p0 = scmp.lt.s32.totalorder %s4342_s28, %s4342_s28 }
  0x35   : > { %p4345_p7 = pnand %p4343_p5, %p4303_p13  ;;  %p4352_p1 = por %p4351_p0, %p4350_p12 }
  0x37   : > { %p4346_p9 = pneg %p4345_p7 }
  0x39   : > { %p4353_p2 = pnand %p4352_p1, %p4346_p9 }
  0x3b   : > { %4356 = shalt.err (!%p4353_p2)
}
  0x3c   : > { %4144 = dma.hbm_to_vmem [thread:$0]  (!%p4564_p11), %s5136_s3, 512, %s4568_s6, [#allocation6], %s4461_s15, %s4461_s15, %s4462_s16  }
  0x3d   : > { %s4629_s29 = sadd.s32 1, %s4457_s21   ;;  %s29_s14 = sadd.s32 1, %s4453_s20 }
  0x3e   : > { %s26_s17 = ssub.s32 %s4457_s21, %s4629_s29  ;;  %p36_p13 = scmp.ne.s32.totalorder %s4453_s20, %s4449_s19 }
  0x3f   : > { %p27_p6 = scmp.eq.s32.totalorder %s26_s17, 0  ;;  %p37_p10 = scmp.eq.s32.totalorder %s4457_s21, 0 }
  0x40   : > { %p5146_p3 = scmp.eq.s32.totalorder %s4534_s22, 1  ;;  %p4155_p7 = scmp.lt.s32.totalorder %s4457_s21, 2 }
  0x41   : > { %s4645_s27 = scalar_select %p27_p6, %s4453_s20, %s29_s14  }
  0x42   : > { %p4639_p5 = por %p5146_p3, %p36_p13  ;;  %p38_p9 = por %p37_p10, %p36_p13 }
  0x43   : > { %s208_s30 = sand.u32 1, %s4453_s20   ;;  %s3786_s6 = sshll.u32 %s4457_s21, 9 }
  0x44   : > { %s5147_s23 = scalar_select %p4639_p5, 1, 0 }
  0x45   : > { %s3699_s7 = sshll.u32 %s208_s30, 5  ;;  %s4652_s10 = scalar_lea.hbm %s5133_s0, %s3786_s6 }
  0x46   : > { %s212_s11 = scalar_lea.vmem [#allocation2], %s3699_s7  ;;  %p4656_p11 = pnand %p4155_p7, %p38_p9 }
  0x47   : > { %s219_s28 = sshll.u32 %s212_s11, 4  ;;  %s4660_s13 = scalar_lea.sflag [#allocation3], %s208_s30  ;;  %s4654_s28 = int_to_ptr.vmem [resolvable:$true] %s219_s28 }
  0x48   : > { %s4357_s14 = scalar_lea.hbm %s4652_s10, 512  ;;  %p4359_p0 = pneg %p4656_p11 }
  0x49   : > { %p4358_p12 = scmp.ne.s32.totalorder %s4652_s10, %s4357_s14  ;;  %s4362_s6 = scalar_lea.hbm %s5133_s0, 1024 }
  0x4a   : > { %p4363_p13 = scmp.lt.u32.totalorder %s4652_s10, %s5133_s0  ;;  %p4364_p6 = scmp.lt.u32.totalorder %s4362_s6, %s4357_s14 }
  0x4b   : > { %p4360_p1 = pnand %p4359_p0, %p4358_p12  ;;  %p4366_p3 = scmp.lt.u32.totalorder %s4357_s14, %s4652_s10 }
  0x4c   : > { %p4365_p10 = por %p4364_p6, %p4363_p13 }
  0x4d   : > { %p4361_p2 = pneg %p4360_p1 }
  0x4e   : > { %p4367_p7 = por %p4366_p3, %p4365_p10 }
  0x50   : > { %p4368_p9 = pnand %p4367_p7, %p4361_p2 }
  0x52   : > { %4371 = shalt.err (!%p4368_p9)
}
  0x53   : > { %s4372_s30 = scalar_lea.vmem %s4654_s28, 512  ;;  %s4463_s11 = smov [#allocation2]  }
  0x54   : > { %p4373_p12 = scmp.ne.s32.totalorder %s4654_s28, %s4372_s30  ;;  %s4377_s17 = sshll.u32 %s4463_s11, 4  ;;  %s4378_s17 = int_to_ptr.vmem [resolvable:$false] %s4377_s17 }
  0x55   : > { %s4379_s7 = scalar_lea.vmem %s4378_s17, 1024  ;;  %p4380_p4 = scmp.lt.s32.totalorder %s4654_s28, %s4378_s17 }
  0x56   : > { %p4375_p1 = pnand %p4373_p12, %p4359_p0  ;;  %p4381_p13 = scmp.lt.s32.totalorder %s4379_s7, %s4372_s30 }
  0x58   : > { %p4376_p5 = pneg %p4375_p1  ;;  %p4382_p6 = por %p4381_p13, %p4380_p4 }
  0x5a   : > { %p4383_p10 = pnand %p4382_p6, %p4376_p5 }
  0x5c   : > { %4386 = shalt.err (!%p4383_p10)
}
  0x5d   : > { %4148 = dma.hbm_to_vmem [thread:$0]  (!%p4656_p11), %s4652_s10, 512, %s4654_s28, %s4660_s13, %s4461_s15, %s4461_s15, %s4462_s16  }
  0x5e   : > { %231 = sbr.rel (%p4553_p8) target bundleno = 3561 (0xde9), region = 40  ;;  %s4694_s14 = sand.u32 (!%p4553_p8), 1, %s4449_s19  }
  0x5f   : > { %s3703_s6 = sshll.u32 (!%p4553_p8), %s4694_s14, 5  ;;  %s234_s8 = scalar_lea.sflag (!%p4553_p8), [#allocation3], %s4694_s14 }
  0x60   : > { %s237_s12 = scalar_lea.vmem (!%p4553_p8), [#allocation2], %s3703_s6  ;;  %p5149_p4 = scmp.ne.s32.totalorder (!%p4553_p8), %s5142_s24, 0 }
  0x65   : > { %4432 = dma.done.wait (%p5149_p4), %s234_s8, 512  }
  0x66   : > { %4434 = vsyncadd (%p5149_p4), %s234_s8, 4294966784  ;;  %p5150_p5 = scmp.eq.s32.totalorder %s4534_s22, 0 }
  0x68   : > { %4436 = dma.done.wait (%p5150_p5), [#allocation6], 1536   ;;  %p5151_p8 = pmov %p5150_p5 }
  0x69   : > { %vm278_vm0 = vcmask 523264   ;;  %v274_v0 = vld [vmem:[%s237_s12] sm:$0xff]  ;;  %v276_v1 = vld [vmem:[%s237_s12 + $0x10] sm:$0xff]  ;;  %v275_v2 = vld [vmem:[%s237_s12 + $0x8] sm:$0xff]  ;;  %v4464_v60 = vmov 0.0   ;;  %vm4465_vm1 = vmmov 0  }
  0x6a   : > { %4438 = vsyncadd (%p5151_p8), [#allocation6], 4294965760  ;;  %v279_v3 = vsel %vm278_vm0, %v274_v0, 0.0  ;;  %v285_v4 = vsel %vm278_vm0, %v276_v1, 0.0  ;;  %v277_v5 = vld [vmem:[%s237_s12 + $0x18] sm:$0xff]  ;;  %v282_v6 = vsel %vm278_vm0, %v275_v2, 0.0  ;;  %3906 = vmatprep.subr.mxu1 %v4464_v60  ;;  %3908 = vmatprep.mubr.msk.f32.mxu1 %vm4465_vm1, %v4464_v60 }
  0x6b   : > { %280 = vadd.xlane.f32.xlu0 %v279_v3  ;;  %286 = vadd.xlane.f32.xlu1 %v285_v4  ;;  %v288_v7 = vsel %vm278_vm0, %v277_v5, 0.0  ;;  %v332_v28 = vld [vmem:[#allocation5] sm:$0xff]  ;;  %v333_v29 = vld [vmem:[#allocation5 + $0x8] sm:$0xff]  ;;  %v334_v31 = vld [vmem:[#allocation5 + $0x10] sm:$0xff]  ;;  %s4466_s15 = smov 96   ;;  %vm475_vm2 = vcmask 64512  }
  0x6c   : > { %v4098_v30 = vpack.c.bf16 %v333_v29, %v332_v28  ;;  %v335_v32 = vld [vmem:[#allocation5 + $0x18] sm:$0xff]  ;;  %v336_v34 = vld [vmem:[#allocation5 + $0x20] sm:$0xff]  ;;  %v337_v35 = vld [vmem:[#allocation5 + $0x28] sm:$0xff]  ;;  %s4467_s16 = smov 64   ;;  %s4468_s10 = smov 88  }
  0x6d   : > { %v4102_v33 = vpack.c.bf16 %v335_v32, %v334_v31  ;;  %v4106_v36 = vpack.c.bf16 %v337_v35, %v336_v34  ;;  %v338_v37 = vld [vmem:[#allocation5 + $0x30] sm:$0xff]  ;;  %v339_v38 = vld [vmem:[#allocation5 + $0x38] sm:$0xff]  ;;  %v3707_v61 = vld [vmem:[%s5135_s2] ss:$0 sm:$0xff]  ;;  %s4469_s28 = smov 120   ;;  %s4470_s13 = smov 56  }
  0x6e   : > { %4099 = vmatprep.subr.bf16.mxu0 %v4098_v30  ;;  %v4110_v39 = vpack.c.bf16 %v339_v38, %v338_v37  ;;  %s4471_s9 = smov 80   ;;  %s4472_s30 = smov 112  }
  0x6f   : > { %283 = vadd.xlane.f32.xlu0 %v282_v6  ;;  %289 = vadd.xlane.f32.xlu1 %v288_v7  ;;  %s4473_s11 = smov 24   ;;  %s4474_s17 = smov 32  }
  0x70   : > { %4101 = vmatpush3.bf16.msra.mxu0 %v4098_v30  ;;  %s4475_s7 = smov 48   ;;  %s4476_s8 = smov 16  }
  0x71   : > { %4103 = vmatprep.subr.bf16.mxu0 %v4102_v33  ;;  %s4477_s12 = smov 72   ;;  %s4478_s24 = smov 104  }
  0x72   : > { %s4479_s26 = smov 40   ;;  %p5152_p0 = scmp.ne.s32.totalorder %s5147_s23, 0 }
  0x74   : > { %4105 = vmatpush3.bf16.msra.mxu0 %v4102_v33 }
  0x75   : > { %4107 = vmatprep.subr.bf16.mxu0 %v4106_v36 }
  0x78   : > { %4109 = vmatpush3.bf16.msra.mxu0 %v4106_v36 }
  0x79   : > { %4111 = vmatprep.subr.bf16.mxu0 %v4110_v39 }
  0x7c   : > { %4113 = vmatpush3.bf16.msra.mxu0 %v4110_v39 }
  0x7d   : > { %3931 = vmatprep.subr.mxu0 %v4464_v60 }
  0xf8   : > { %v281_v8 = vpop.xlane.xlu0 %280  ;;  %v287_v9 = vpop.xlane.xlu1 %286 }
  0xf9   : > { %v292_v10 = vmul.f32 0.015625, %v281_v8  ;;  %v294_v11 = vmul.f32 0.015625, %v287_v9 }
  0xfb   : > { %v296_v12 = vsub.f32 %v274_v0, %v292_v10  ;;  %v298_v13 = vsub.f32 %v276_v1, %v294_v11 }
  0xfc   : > { %v284_v14 = vpop.xlane.xlu0 %283  ;;  %v290_v15 = vpop.xlane.xlu1 %289 }
  0xfd   : > { %v293_v16 = vmul.f32 0.015625, %v284_v14  ;;  %v295_v17 = vmul.f32 0.015625, %v290_v15  ;;  %v300_v18 = vmul.f32 %v296_v12, %v296_v12  ;;  %v302_v19 = vmul.f32 %v298_v13, %v298_v13 }
  0xff   : > { %v297_v20 = vsub.f32 %v275_v2, %v293_v16  ;;  %v299_v21 = vsub.f32 %v277_v5, %v295_v17  ;;  %v304_v22 = vsel %vm278_vm0, %v300_v18, 0.0  ;;  %v310_v23 = vsel %vm278_vm0, %v302_v19, 0.0 }
 0x100   : > { %305 = vadd.xlane.f32.xlu0 %v304_v22 }
 0x101   : > { %v301_v24 = vmul.f32 %v297_v20, %v297_v20  ;;  %v303_v25 = vmul.f32 %v299_v21, %v299_v21 }
 0x103   : > { %v307_v26 = vsel %vm278_vm0, %v301_v24, 0.0  ;;  %v313_v27 = vsel %vm278_vm0, %v303_v25, 0.0 }
 0x104   : > { %311 = vadd.xlane.f32.xlu0 %v310_v23  ;;  %308 = vadd.xlane.f32.xlu1 %v307_v26 }
 0x108   : > { %314 = vadd.xlane.f32.xlu1 %v313_v27 }
 0x18d   : > { %v306_v40 = vpop.xlane.xlu0 %305 }
 0x18e   : > { %v316_v41 = vmul.f32 0.015625, %v306_v40 }
 0x190   : > { %v320_v42 = vadd.f32 1e-05, %v316_v41 }
 0x191   : > { %v309_v43 = vpop.xlane.xlu1 %308  ;;  %v312_v44 = vpop.xlane.xlu0 %311 }
 0x192   : > { %4213 = vrsqrt.f32 %v320_v42  ;;  %v317_v45 = vmul.f32 0.015625, %v309_v43  ;;  %v318_v46 = vmul.f32 0.015625, %v312_v44 }
 0x194   : > { %v321_v47 = vadd.f32 1e-05, %v317_v45  ;;  %v322_v48 = vadd.f32 1e-05, %v318_v46 }
 0x195   : > { %v315_v49 = vpop.xlane.xlu1 %314 }
 0x196   : > { %4215 = vrsqrt.f32 %v321_v47  ;;  %v319_v50 = vmul.f32 0.015625, %v315_v49 }
 0x197   : > { %4217 = vrsqrt.f32 %v322_v48 }
 0x198   : > { %v323_v51 = vadd.f32 1e-05, %v319_v50 }
 0x19a   : > { %4219 = vrsqrt.f32 %v323_v51 }
 0x19c   : > { %v4214_v52 = vpop.eup %4213 }
 0x19d   : > { %v328_v53 = vmul.f32 %v4214_v52, %v296_v12 }
 0x19f   : > { %3900 = vmatprep.mubr.msk.f32.mxu0 %vm278_vm0, %v328_v53 }
 0x1a0   : > { %v4216_v54 = vpop.eup %4215 }
 0x1a1   : > { %v4218_v55 = vpop.eup %4217  ;;  %v329_v56 = vmul.f32 %v4216_v54, %v297_v20 }
 0x1a2   : > { %v330_v57 = vmul.f32 %v4218_v55, %v298_v13 }
 0x1a3   : > { %3901 = vmatmul.mubr.msk.f32.vlgmr.msra.gmra.mrb[0].mxu0 %vm278_vm0, %v329_v56 }
 0x1a4   : > { %v4220_v58 = vpop.eup %4219  ;;  %3903 = vmatprep.mubr.msk.f32.mxu0 %vm278_vm0, %v330_v57 }
 0x1a5   : > { %v331_v59 = vmul.f32 %v4220_v58, %v299_v21 }
 0x1a7   : > { %3904 = vmatmul.mubr.msk.f32.gmra.mrb[2].mxu0 %vm278_vm0, %v331_v59 }
 0x1a8   : > { %3933 = vmatprep.mubr.msk.f32.mxu0 %vm4465_vm1, %v4464_v60 }
 0x276   : > { %v3902_v62 = vpop.f32.mrb[0].mxu0 }
 0x277   : > { %v4729_v63 = vadd.f32 %v3902_v62, %v3707_v61  ;;  %v425_v0 = vpop.f32.mrb[1].mxu0 }
 0x278   : > { %v4731_v1 = vadd.f32 %v3707_v61, %v425_v0 }
 0x279   : > { %551 = vrot.lane.b32.xlu1 %v4729_v63, %s4466_s15 }
 0x27a   : > { %473 = vrot.lane.b32.xlu0 %v4731_v1, %s4466_s15  ;;  %v3905_v2 = vpop.f32.mrb[2].mxu0 }
 0x27b   : > { %v435_v3 = vpop.f32.mrb[3].mxu0  ;;  %v4738_v5 = vadd.f32 %v3905_v2, %v3707_v61 }
 0x27c   : > { %v4735_v4 = vadd.f32 %v3707_v61, %v435_v3 }
 0x27e   : > { %628 = vrot.lane.b32.xlu1 %v4735_v4, %s4466_s15 }
 0x282   : > { %705 = vrot.lane.b32.xlu1 %v4738_v5, %s4466_s15  ;;  %s4480_s15 = smov 8  }
 0x2eb   : > { %v552_v6 = vpop.permute.xlu1 %551 }
 0x2ec   : > { %v474_v7 = vpop.permute.xlu0 %473 }
 0x2ed   : > { %3907 = vmatpush3.xpose.msk.msra.mxu1 %vm475_vm2, %v474_v7 }
 0x2ee   : > { %3911 = vmatprep.subr.mxu1 %v4464_v60 }
 0x2f0   : > { %3909 = vmatmul.mubr.msk.f32.vlgmr.msra.gmra.mrb[0].mxu1 %vm475_vm2, %v4731_v1  ;;  %v629_v8 = vpop.permute.xlu1 %628 }
 0x2f1   : > { %3912 = vmatpush3.xpose.msk.msra.mxu1 %vm475_vm2, %v552_v6  ;;  %3913 = vmatprep.mubr.msk.f32.mxu1 %vm4465_vm1, %v4464_v60 }
 0x2f2   : > { %3916 = vmatprep.subr.mxu1 %v4464_v60 }
 0x2f4   : > { %3914 = vmatmul.mubr.msk.f32.vlgmr.msra.gmra.mrb[2].mxu1 %vm475_vm2, %v4729_v63  ;;  %v706_v9 = vpop.permute.xlu1 %705 }
 0x2f5   : > { %3917 = vmatpush3.xpose.msk.msra.mxu1 %vm475_vm2, %v629_v8  ;;  %3918 = vmatprep.mubr.msk.f32.mxu1 %vm4465_vm1, %v4464_v60 }
 0x2f6   : > { %3921 = vmatprep.subr.mxu1 %v4464_v60 }
 0x2f8   : > { %3919 = vmatmul.mubr.msk.f32.vlgmr.msra.gmra.mrb[4].mxu1 %vm475_vm2, %v4735_v4 }
 0x2f9   : > { %3922 = vmatpush3.xpose.msk.msra.mxu1 %vm475_vm2, %v706_v9  ;;  %3923 = vmatprep.mubr.msk.f32.mxu1 %vm4465_vm1, %v4464_v60 }
 0x2fa   : > { %3926 = vmatprep.subr.mxu1 %v4464_v60 }
 0x2fc   : > { %3924 = vmatmul.mubr.msk.f32.vlgmr.msra.gmra.mrb[6].mxu1 %vm475_vm2, %v4738_v5 }
 0x2fd   : > { %3928 = vmatprep.mubr.msk.f32.mxu1 %vm4465_vm1, %v4464_v60 }
 0x3c3   : > { %v4765_v10 = vpop.f32.mrb[0].mxu1 }
 0x3c4   : > { %v3910_v11 = vpop.f32.mrb[1].mxu1  ;;  %v781_v31 = vsel %vm475_vm2, %v4765_v10, -inf }
 0x3c7   : > { %v623_v12 = vpop.f32.mrb[2].mxu1 }
 0x3c8   : > { %v3915_v13 = vpop.f32.mrb[3].mxu1  ;;  %v784_v14 = vsel %vm475_vm2, %v623_v12, -inf }
 0x3c9   : > { %785 = vmax.xlane.f32.xlu0 %v784_v14 }
 0x3cb   : > { %v4768_v15 = vpop.f32.mrb[4].mxu1 }
 0x3cc   : > { %v3920_v16 = vpop.f32.mrb[5].mxu1  ;;  %v787_v20 = vsel %vm475_vm2, %v4768_v15, -inf }
 0x3cf   : > { %v777_v17 = vpop.f32.mrb[6].mxu1 }
 0x3d0   : > { %v3925_v18 = vpop.f32.mrb[7].mxu1  ;;  %v790_v19 = vsel %vm475_vm2, %v777_v17, -inf }
 0x3d1   : > { %791 = vmax.xlane.f32.xlu1 %v790_v19 }
 0x3e2   : > { %1053 = vrot.lane.b32.xlu1 %v4738_v5, %s4467_s16 }
 0x3e6   : > { %1229 = vrot.lane.b32.xlu1 %v4729_v63, %s4468_s10 }
 0x3ea   : > { %1227 = vrot.lane.b32.xlu1 %v4729_v63, %s4469_s28 }
 0x3ee   : > { %1383 = vrot.lane.b32.xlu1 %v4738_v5, %s4469_s28 }
 0x412   : > { %788 = vmax.xlane.f32.xlu1 %v787_v20 }
 0x423   : > { %977 = vrot.lane.b32.xlu1 %v4735_v4, %s4467_s16 }
 0x427   : > { %1151 = vrot.lane.b32.xlu1 %v4731_v1, %s4468_s10 }
 0x42b   : > { %1149 = vrot.lane.b32.xlu1 %v4731_v1, %s4469_s28 }
 0x42f   : > { %1305 = vrot.lane.b32.xlu1 %v4735_v4, %s4469_s28  ;;  %s271_s28 = scalar_lea.vmem [#allocation8], %s3703_s6 }
 0x456   : > { %v786_v21 = vpop.xlane.xlu0 %785 }
 0x457   : > { %v794_v22 = vsub.f32 %v623_v12, %v786_v21 }
 0x459   : > { %v799_v23 = vmul.f32 1.442695, %v794_v22 }
 0x45b   : > { %4221 = vpow2.f32 %v799_v23 }
 0x45e   : > { %v792_v24 = vpop.xlane.xlu1 %791 }
 0x45f   : > { %v796_v25 = vsub.f32 %v777_v17, %v792_v24 }
 0x461   : > { %v803_v26 = vmul.f32 1.442695, %v796_v25 }
 0x462   : > { %v1054_v35 = vpop.permute.xlu1 %1053 }
 0x463   : > { %4223 = vpow2.f32 %v803_v26 }
 0x465   : > { %v4222_v27 = vpop.eup %4221 }
 0x466   : > { %v808_v28 = vsel %vm475_vm2, %v4222_v27, 0.0  ;;  %v1230_v38 = vpop.permute.xlu1 %1229 }
 0x467   : > { %809 = vadd.xlane.f32.xlu0 %v808_v28 }
 0x46a   : > { %v1228_v41 = vpop.permute.xlu1 %1227 }
 0x46d   : > { %v4224_v29 = vpop.eup %4223 }
 0x46e   : > { %v814_v30 = vsel %vm475_vm2, %v4224_v29, 0.0  ;;  %v1384_v43 = vpop.permute.xlu1 %1383 }
 0x46f   : > { %815 = vadd.xlane.f32.xlu0 %v814_v30 }
 0x485   : > { %901 = vrot.lane.b32.xlu0 %v4729_v63, %s4467_s16 }
 0x489   : > { %1385 = vrot.lane.b32.xlu0 %v4738_v5, %s4468_s10 }
 0x49f   : > { %v789_v44 = vpop.xlane.xlu1 %788 }
 0x4a0   : > { %v795_v45 = vsub.f32 %v4768_v15, %v789_v44 }
 0x4a2   : > { %v801_v48 = vmul.f32 1.442695, %v795_v45 }
 0x4a3   : > { %v978_v59 = vpop.permute.xlu1 %977 }
 0x4a7   : > { %v1152_v9 = vpop.permute.xlu1 %1151 }
 0x4a8   : > { %782 = vmax.xlane.f32.xlu0 %v781_v31 }
 0x4ab   : > { %v1150_v14 = vpop.permute.xlu1 %1149 }
 0x4af   : > { %v1306_v16 = vpop.permute.xlu1 %1305 }
 0x4f4   : > { %v810_v32 = vpop.xlane.xlu0 %809 }
 0x4f5   : > { %4225 = vrcp.f32 %v810_v32 }
 0x4fc   : > { %v816_v33 = vpop.xlane.xlu0 %815 }
 0x4fd   : > { %4227 = vrcp.f32 %v816_v33 }
 0x4ff   : > { %v4226_v34 = vpop.eup %4225 }
 0x500   : > { %v822_v36 = vmul.f32 %v4226_v34, %v4222_v27  ;;  %v902_v37 = vpop.permute.xlu0 %901 }
 0x501   : > { %3932 = vmatpush3.msra.mxu0 %v902_v37 }
 0x502   : > { %3934 = vmatmul.mubr.msk.f32.vlgmr.msra.gmra.mrb[4].mxu0 %vm475_vm2, %v822_v36  ;;  %3941 = vmatprep.subr.mxu0 %v4464_v60 }
 0x503   : > { %3942 = vmatpush3.msra.mxu0 %v1054_v35  ;;  %3943 = vmatprep.mubr.msk.f32.mxu0 %vm4465_vm1, %v4464_v60 }
 0x504   : > { %3951 = vmatprep.subr.mxu0 %v4464_v60  ;;  %v1386_v42 = vpop.permute.xlu0 %1385 }
 0x507   : > { %v4228_v39 = vpop.eup %4227 }
 0x508   : > { %v824_v40 = vmul.f32 %v4228_v39, %v4224_v29 }
 0x50a   : > { %3944 = vmatmul.mubr.msk.f32.vlgmr.msra.gmra.mrb[6].mxu0 %vm475_vm2, %v824_v40 }
 0x50b   : > { %3952 = vmatpush3.xpose.msk.msra.mxu0 %vm475_vm2, %v1230_v38  ;;  %3953 = vmatprep.mubr.msk.f32.mxu0 %vm4465_vm1, %v4464_v60 }
 0x50c   : > { %3961 = vmatprep.subr.mxu0 %v4464_v60 }
 0x50e   : > { %3954 = vmatmul.mubr.msk.f32.vlgmr.msra.gmra.mrb[8].mxu0 %vm475_vm2, %v1228_v41 }
 0x50f   : > { %3962 = vmatpush3.xpose.msk.msra.mxu0 %vm475_vm2, %v1386_v42  ;;  %3963 = vmatprep.mubr.msk.f32.mxu0 %vm4465_vm1, %v4464_v60 }
 0x510   : > { %3971 = vmatprep.subr.mxu0 %v4464_v60 }
 0x512   : > { %3964 = vmatmul.mubr.msk.f32.vlgmr.msra.gmra.mrb[10].mxu0 %vm475_vm2, %v1384_v43 }
 0x513   : > { %3973 = vmatprep.mubr.msk.f32.mxu0 %vm4465_vm1, %v4464_v60 }
 0x535   : > { %v783_v46 = vpop.xlane.xlu0 %782 }
 0x536   : > { %v793_v47 = vsub.f32 %v4765_v10, %v783_v46 }
 0x538   : > { %v797_v49 = vmul.f32 1.442695, %v793_v47 }
 0x53a   : > { %4229 = vpow2.f32 %v797_v49 }
 0x53b   : > { %4231 = vpow2.f32 %v801_v48 }
 0x544   : > { %v4230_v50 = vpop.eup %4229 }
 0x545   : > { %v805_v51 = vsel %vm475_vm2, %v4230_v50, 0.0  ;;  %v4232_v52 = vpop.eup %4231 }
 0x546   : > { %806 = vadd.xlane.f32.xlu0 %v805_v51  ;;  %v811_v53 = vsel %vm475_vm2, %v4232_v52, 0.0 }
 0x54a   : > { %812 = vadd.xlane.f32.xlu0 %v811_v53 }
 0x560   : > { %825 = vrot.lane.b32.xlu0 %v4731_v1, %s4467_s16 }
 0x564   : > { %1307 = vrot.lane.b32.xlu0 %v4735_v4, %s4468_s10 }
 0x5d3   : > { %v807_v54 = vpop.xlane.xlu0 %806 }
 0x5d4   : > { %4233 = vrcp.f32 %v807_v54 }
 0x5d5   : > { %v4819_v55 = vpop.f32.mrb[4].mxu0 }
 0x5d6   : > { %v3935_v56 = vpop.f32.mrb[5].mxu0 }
 0x5d7   : > { %v813_v57 = vpop.xlane.xlu0 %812 }
 0x5d8   : > { %4235 = vrcp.f32 %v813_v57 }
 0x5db   : > { %v826_v58 = vpop.permute.xlu0 %825 }
 0x5dc   : > { %3927 = vmatpush3.msra.mxu1 %v826_v58 }
 0x5dd   : > { %v4821_v61 = vpop.f32.mrb[6].mxu0  ;;  %3936 = vmatprep.subr.mxu1 %v4464_v60 }
 0x5de   : > { %v4234_v62 = vpop.eup %4233  ;;  %v3945_v0 = vpop.f32.mrb[7].mxu0 }
 0x5df   : > { %v821_v2 = vmul.f32 %v4234_v62, %v4230_v50  ;;  %v1308_v15 = vpop.permute.xlu0 %1307 }
 0x5e1   : > { %3929 = vmatmul.mubr.msk.f32.vlgmr.msra.gmra.mrb[8].mxu1 %vm475_vm2, %v821_v2  ;;  %v1301_v3 = vpop.f32.mrb[8].mxu0 }
 0x5e2   : > { %v4236_v6 = vpop.eup %4235  ;;  %3937 = vmatpush3.msra.mxu1 %v978_v59  ;;  %v3955_v7 = vpop.f32.mrb[9].mxu0  ;;  %v1464_v8 = vsel %vm475_vm2, %v1301_v3, -inf  ;;  %3938 = vmatprep.mubr.msk.f32.mxu1 %vm4465_vm1, %v4464_v60 }
 0x5e3   : > { %v823_v10 = vmul.f32 %v4236_v6, %v4232_v52  ;;  %1465 = vmax.xlane.f32.xlu0 %v1464_v8  ;;  %3946 = vmatprep.subr.mxu1 %v4464_v60 }
 0x5e5   : > { %3939 = vmatmul.mubr.msk.f32.vlgmr.msra.gmra.mrb[10].mxu1 %vm475_vm2, %v823_v10  ;;  %v1457_v11 = vpop.f32.mrb[10].mxu0 }
 0x5e6   : > { %v3965_v12 = vpop.f32.mrb[11].mxu0  ;;  %v1470_v13 = vsel %vm475_vm2, %v1457_v11, -inf  ;;  %3948 = vmatprep.mubr.msk.f32.mxu1 %vm4465_vm1, %v4464_v60 }
 0x5e7   : > { %1471 = vmax.xlane.f32.xlu1 %v1470_v13  ;;  %v3713_v13 = vmul.f32 -1.442695, %v4729_v63 }
 0x5e9   : > { %3947 = vmatpush3.xpose.msk.msra.mxu1 %vm475_vm2, %v1152_v9 }
 0x5ea   : > { %3956 = vmatprep.subr.mxu1 %v4464_v60 }
 0x5ec   : > { %3949 = vmatmul.mubr.msk.f32.vlgmr.msra.gmra.mrb[12].mxu1 %vm475_vm2, %v1150_v14 }
 0x5ed   : > { %3957 = vmatpush3.xpose.msk.msra.mxu1 %vm475_vm2, %v1308_v15  ;;  %3958 = vmatprep.mubr.msk.f32.mxu1 %vm4465_vm1, %v4464_v60  ;;  %v3712_v15 = vmul.f32 -1.442695, %v4731_v1 }
 0x5ee   : > { %3966 = vmatprep.subr.mxu1 %v4464_v60 }
 0x5f0   : > { %3959 = vmatmul.mubr.msk.f32.vlgmr.msra.gmra.mrb[14].mxu1 %vm475_vm2, %v1306_v16 }
 0x5f1   : > { %3968 = vmatprep.mubr.msk.f32.mxu1 %vm4465_vm1, %v4464_v60 }
 0x5f8   : > { %1733 = vrot.lane.b32.xlu1 %v4738_v5, %s4470_s13 }
 0x5fc   : > { %2021 = vrot.lane.b32.xlu1 %v4731_v1, %s4471_s9 }
 0x600   : > { %2019 = vrot.lane.b32.xlu1 %v4731_v1, %s4472_s30 }
 0x604   : > { %2097 = vrot.lane.b32.xlu1 %v4729_v63, %s4472_s30 }
 0x608   : > { %2175 = vrot.lane.b32.xlu1 %v4735_v4, %s4472_s30 }
 0x60c   : > { %2253 = vrot.lane.b32.xlu1 %v4738_v5, %s4472_s30 }
 0x670   : > { %v1466_v17 = vpop.xlane.xlu0 %1465 }
 0x671   : > { %v1474_v18 = vsub.f32 %v1301_v3, %v1466_v17 }
 0x673   : > { %v1479_v19 = vmul.f32 1.442695, %v1474_v18 }
 0x674   : > { %v1472_v20 = vpop.xlane.xlu1 %1471 }
 0x675   : > { %4237 = vpow2.f32 %v1479_v19  ;;  %v1476_v21 = vsub.f32 %v1457_v11, %v1472_v20  ;;  %v3714_v20 = vmul.f32 -1.442695, %v4735_v4 }
 0x677   : > { %v1483_v22 = vmul.f32 1.442695, %v1476_v21 }
 0x678   : > { %v1734_v39 = vpop.permute.xlu1 %1733 }
 0x679   : > { %4239 = vpow2.f32 %v1483_v22 }
 0x67c   : > { %v2022_v42 = vpop.permute.xlu1 %2021 }
 0x67f   : > { %v4238_v23 = vpop.eup %4237 }
 0x680   : > { %v1488_v24 = vsel %vm475_vm2, %v4238_v23, 0.0  ;;  %v2020_v46 = vpop.permute.xlu1 %2019 }
 0x681   : > { %1489 = vadd.xlane.f32.xlu0 %v1488_v24 }
 0x683   : > { %v4240_v25 = vpop.eup %4239 }
 0x684   : > { %v1494_v26 = vsel %vm475_vm2, %v4240_v25, 0.0  ;;  %v2098_v48 = vpop.permute.xlu1 %2097 }
 0x685   : > { %1495 = vadd.xlane.f32.xlu0 %v1494_v26 }
 0x688   : > { %v2176_v50 = vpop.permute.xlu1 %2175 }
 0x68c   : > { %v2254_v52 = vpop.permute.xlu1 %2253 }
 0x69b   : > { %1581 = vrot.lane.b32.xlu0 %v4729_v63, %s4470_s13 }
 0x69f   : > { %2099 = vrot.lane.b32.xlu0 %v4729_v63, %s4471_s9 }
 0x6a3   : > { %2177 = vrot.lane.b32.xlu0 %v4735_v4, %s4471_s9 }
 0x6a7   : > { %2255 = vrot.lane.b32.xlu0 %v4738_v5, %s4471_s9  ;;  %s3787_s9 = sshll.u32 %s4534_s22, 9 }
 0x6a8   : > { %s5086_s6 = scalar_lea.hbm %s5138_s5, %s3787_s9 }
 0x6b4   : > { %v4857_v27 = vpop.f32.mrb[8].mxu1 }
 0x6b5   : > { %v3930_v28 = vpop.f32.mrb[9].mxu1 }
 0x6b6   : > { %v3715_v28 = vmul.f32 -1.442695, %v4738_v5 }
 0x6b8   : > { %v4859_v29 = vpop.f32.mrb[10].mxu1 }
 0x6b9   : > { %v3940_v30 = vpop.f32.mrb[11].mxu1 }
 0x6bf   : > { %v1223_v31 = vpop.f32.mrb[12].mxu1 }
 0x6c0   : > { %v3950_v32 = vpop.f32.mrb[13].mxu1  ;;  %v1461_v36 = vsel %vm475_vm2, %v1223_v31, -inf }
 0x6c3   : > { %v1379_v33 = vpop.f32.mrb[14].mxu1 }
 0x6c4   : > { %v3960_v34 = vpop.f32.mrb[15].mxu1  ;;  %v1467_v35 = vsel %vm475_vm2, %v1379_v33, -inf }
 0x6c5   : > { %1468 = vmax.xlane.f32.xlu1 %v1467_v35 }
 0x6c6   : > { %1462 = vmax.xlane.f32.xlu0 %v1461_v36 }
 0x6d6   : > { %1657 = vrot.lane.b32.xlu1 %v4735_v4, %s4470_s13 }
 0x70e   : > { %v1490_v37 = vpop.xlane.xlu0 %1489 }
 0x70f   : > { %4241 = vrcp.f32 %v1490_v37 }
 0x712   : > { %v1496_v38 = vpop.xlane.xlu0 %1495 }
 0x713   : > { %4243 = vrcp.f32 %v1496_v38 }
 0x716   : > { %v1582_v40 = vpop.permute.xlu0 %1581 }
 0x717   : > { %3972 = vmatpush3.msra.mxu0 %v1582_v40 }
 0x718   : > { %3981 = vmatprep.subr.mxu0 %v4464_v60 }
 0x719   : > { %v4242_v41 = vpop.eup %4241 }
 0x71a   : > { %v1502_v43 = vmul.f32 %v4242_v41, %v4238_v23  ;;  %v2100_v47 = vpop.permute.xlu0 %2099 }
 0x71c   : > { %3974 = vmatmul.mubr.msk.f32.vlgmr.msra.gmra.mrb[12].mxu0 %vm475_vm2, %v1502_v43 }
 0x71d   : > { %v4244_v44 = vpop.eup %4243  ;;  %3982 = vmatpush3.msra.mxu0 %v1734_v39  ;;  %3983 = vmatprep.mubr.msk.f32.mxu0 %vm4465_vm1, %v4464_v60 }
 0x71e   : > { %v1504_v45 = vmul.f32 %v4244_v44, %v4240_v25  ;;  %4002 = vmatprep.subr.mxu0 %v4464_v60  ;;  %v2178_v49 = vpop.permute.xlu0 %2177 }
 0x720   : > { %3984 = vmatmul.mubr.msk.f32.vlgmr.msra.gmra.mrb[14].mxu0 %vm475_vm2, %v1504_v45 }
 0x721   : > { %4004 = vmatprep.mubr.msk.f32.mxu0 %vm4465_vm1, %v4464_v60 }
 0x722   : > { %v2256_v51 = vpop.permute.xlu0 %2255 }
 0x724   : > { %4003 = vmatpush3.xpose.msk.msra.mxu0 %vm475_vm2, %v2022_v42 }
 0x725   : > { %4007 = vmatprep.subr.mxu0 %v4464_v60 }
 0x727   : > { %4005 = vmatmul.mubr.msk.f32.vlgmr.msra.gmra.mrb[16].mxu0 %vm475_vm2, %v2020_v46 }
 0x728   : > { %4008 = vmatpush3.xpose.msk.msra.mxu0 %vm475_vm2, %v2100_v47  ;;  %4009 = vmatprep.mubr.msk.f32.mxu0 %vm4465_vm1, %v4464_v60 }
 0x729   : > { %4012 = vmatprep.subr.mxu0 %v4464_v60 }
 0x72b   : > { %4010 = vmatmul.mubr.msk.f32.vlgmr.msra.gmra.mrb[18].mxu0 %vm475_vm2, %v2098_v48  ;;  %v469_v48 = vld [vmem:[#allocation7 + $0x8] sm:$0xff] }
 0x72c   : > { %4013 = vmatpush3.xpose.msk.msra.mxu0 %vm475_vm2, %v2178_v49  ;;  %4014 = vmatprep.mubr.msk.f32.mxu0 %vm4465_vm1, %v4464_v60  ;;  %v4940_v49 = vld [vmem:[#allocation7] sm:$0xff] }
 0x72d   : > { %4017 = vmatprep.subr.mxu0 %v4464_v60 }
 0x72f   : > { %4015 = vmatmul.mubr.msk.f32.vlgmr.msra.gmra.mrb[20].mxu0 %vm475_vm2, %v2176_v50 }
 0x730   : > { %4018 = vmatpush3.xpose.msk.msra.mxu0 %vm475_vm2, %v2256_v51  ;;  %4019 = vmatprep.mubr.msk.f32.mxu0 %vm4465_vm1, %v4464_v60 }
 0x731   : > { %4027 = vmatprep.subr.mxu0 %v4464_v60 }
 0x733   : > { %4020 = vmatmul.mubr.msk.f32.vlgmr.msra.gmra.mrb[22].mxu0 %vm475_vm2, %v2254_v52 }
 0x734   : > { %4029 = vmatprep.mubr.msk.f32.mxu0 %vm4465_vm1, %v4464_v60 }
 0x752   : > { %v1469_v53 = vpop.xlane.xlu1 %1468 }
 0x753   : > { %v1475_v54 = vsub.f32 %v1379_v33, %v1469_v53  ;;  %v1463_v56 = vpop.xlane.xlu0 %1462 }
 0x754   : > { %v1473_v57 = vsub.f32 %v1223_v31, %v1463_v56 }
 0x755   : > { %v1481_v58 = vmul.f32 1.442695, %v1475_v54 }
 0x756   : > { %v1477_v59 = vmul.f32 1.442695, %v1473_v57  ;;  %v1658_v22 = vpop.permute.xlu1 %1657 }
 0x758   : > { %4245 = vpow2.f32 %v1477_v59 }
 0x759   : > { %4247 = vpow2.f32 %v1481_v58 }
 0x762   : > { %v4246_v62 = vpop.eup %4245 }
 0x763   : > { %v1485_v0 = vsel %vm475_vm2, %v4246_v62, 0.0  ;;  %v4248_v2 = vpop.eup %4247 }
 0x764   : > { %1486 = vadd.xlane.f32.xlu0 %v1485_v0  ;;  %v1491_v3 = vsel %vm475_vm2, %v4248_v2, 0.0 }
 0x768   : > { %1492 = vadd.xlane.f32.xlu0 %v1491_v3 }
 0x77e   : > { %1505 = vrot.lane.b32.xlu0 %v4731_v1, %s4470_s13  ;;  %s3602_s13 = sshll.u32 %s271_s28, 4  ;;  %s5081_s13 = int_to_ptr.vmem [resolvable:$true] %s3602_s13 }
 0x77f   : > { %s4387_s22 = scalar_lea.vmem %s5081_s13, 512 }
 0x780   : > { %p4388_p11 = scmp.ne.s32.totalorder %s5081_s13, %s4387_s22 }
 0x782   : > { %p4389_p2 = pnand %p4388_p11, %p5152_p0 }
 0x784   : > { %p4390_p3 = pneg %p4389_p2 }
 0x7ef   : > { %v4897_v6 = vpop.f32.mrb[12].mxu0 }
 0x7f0   : > { %v3975_v7 = vpop.f32.mrb[13].mxu0 }
 0x7f1   : > { %v1487_v8 = vpop.xlane.xlu0 %1486 }
 0x7f2   : > { %4249 = vrcp.f32 %v1487_v8 }
 0x7f3   : > { %v4899_v9 = vpop.f32.mrb[14].mxu0 }
 0x7f4   : > { %v3985_v10 = vpop.f32.mrb[15].mxu0 }
 0x7f5   : > { %v1493_v11 = vpop.xlane.xlu0 %1492 }
 0x7f6   : > { %4251 = vrcp.f32 %v1493_v11 }
 0x7f7   : > { %4253 = vpow2.f32 %v3713_v13 }
 0x7f8   : > { %4255 = vpow2.f32 %v3712_v15 }
 0x7f9   : > { %v1506_v12 = vpop.permute.xlu0 %1505  ;;  %4257 = vpow2.f32 %v3714_v20 }
 0x7fa   : > { %v4902_v14 = vpop.f32.mrb[16].mxu0  ;;  %3967 = vmatpush3.msra.mxu1 %v1506_v12  ;;  %4259 = vpow2.f32 %v3715_v28 }
 0x7fb   : > { %v4006_v16 = vpop.f32.mrb[17].mxu0  ;;  %v2331_v17 = vsel %vm475_vm2, %v4902_v14, -inf  ;;  %3976 = vmatprep.subr.mxu1 %v4464_v60 }
 0x7fc   : > { %v4250_v18 = vpop.eup %4249  ;;  %2332 = vmax.xlane.f32.xlu1 %v2331_v17 }
 0x7fd   : > { %v1501_v19 = vmul.f32 %v4250_v18, %v4246_v62 }
 0x7fe   : > { %v4909_v21 = vpop.f32.mrb[18].mxu0 }
 0x7ff   : > { %v4011_v23 = vpop.f32.mrb[19].mxu0  ;;  %v2334_v24 = vsel %vm475_vm2, %v4909_v21, -inf  ;;  %3969 = vmatmul.mubr.msk.f32.vlgmr.msra.gmra.mrb[16].mxu1 %vm475_vm2, %v1501_v19 }
 0x800   : > { %v4252_v25 = vpop.eup %4251  ;;  %2335 = vmax.xlane.f32.xlu0 %v2334_v24  ;;  %3977 = vmatpush3.msra.mxu1 %v1658_v22 }
 0x801   : > { %v1503_v26 = vmul.f32 %v4252_v25, %v4248_v2  ;;  %3978 = vmatprep.mubr.msk.f32.mxu1 %vm4465_vm1, %v4464_v60  ;;  %v4254_v34 = vpop.eup %4253  ;;  %3986 = vmatprep.subr.mxu1 %v469_v48 }
 0x802   : > { %v2249_v30 = vpop.f32.mrb[20].mxu0  ;;  %v4256_v37 = vpop.eup %4255  ;;  %v457_v38 = vadd.f32 1.0, %v4254_v34 }
 0x803   : > { %v4016_v31 = vpop.f32.mrb[21].mxu0  ;;  %v2337_v32 = vsel %vm475_vm2, %v2249_v30, -inf  ;;  %3979 = vmatmul.mubr.msk.f32.vlgmr.msra.gmra.mrb[18].mxu1 %vm475_vm2, %v1503_v26  ;;  %v4258_v39 = vpop.eup %4257  ;;  %v456_v40 = vadd.f32 1.0, %v4256_v37 }
 0x804   : > { %2338 = vmax.xlane.f32.xlu0 %v2337_v32  ;;  %4261 = vrcp.f32 %v457_v38  ;;  %v458_v41 = vadd.f32 1.0, %v4258_v39  ;;  %v4260_v42 = vpop.eup %4259  ;;  %3987 = vmatpush3.msra.mxu1 %v469_v48 }
 0x805   : > { %4263 = vrcp.f32 %v456_v40  ;;  %v459_v43 = vadd.f32 1.0, %v4260_v42  ;;  %3994 = vmatprep.subr.mxu1 %v4940_v49 }
 0x806   : > { %v2327_v33 = vpop.f32.mrb[22].mxu0  ;;  %4265 = vrcp.f32 %v458_v41 }
 0x807   : > { %v4021_v35 = vpop.f32.mrb[23].mxu0  ;;  %v2340_v36 = vsel %vm475_vm2, %v2327_v33, -inf  ;;  %4267 = vrcp.f32 %v459_v43 }
 0x808   : > { %2341 = vmax.xlane.f32.xlu1 %v2340_v36 }
 0x80e   : > { %v4920_v44 = vpop.eup %4261 }
 0x80f   : > { %v4922_v45 = vpop.eup %4263 }
 0x810   : > { %v4926_v46 = vpop.eup %4265 }
 0x811   : > { %v4930_v47 = vpop.eup %4267 }
 0x819   : > { %1811 = vrot.lane.b32.xlu1 %v4920_v44, %s4473_s11 }
 0x81a   : > { %1809 = vrot.lane.b32.xlu0 %v4922_v45, %s4473_s11 }
 0x81d   : > { %1813 = vrot.lane.b32.xlu1 %v4926_v46, %s4473_s11 }
 0x81e   : > { %1133 = vrot.lane.b32.xlu0 %v4922_v45, %s4474_s17 }
 0x821   : > { %1815 = vrot.lane.b32.xlu1 %v4930_v47, %s4473_s11 }
 0x822   : > { %1137 = vrot.lane.b32.xlu0 %v4926_v46, %s4474_s17 }
 0x825   : > { %1135 = vrot.lane.b32.xlu1 %v4920_v44, %s4474_s17 }
 0x826   : > { %2375 = vrot.lane.b32.xlu0 %v4731_v1, %s4475_s7 }
 0x829   : > { %1139 = vrot.lane.b32.xlu1 %v4930_v47, %s4474_s17  ;;  %s3589_s17 = scalar_lea.sflag [#allocation4], %s4694_s14 }
 0x82d   : > { %2451 = vrot.lane.b32.xlu1 %v4729_v63, %s4475_s7 }
 0x889   : > { %v2333_v50 = vpop.xlane.xlu1 %2332 }
 0x88a   : > { %v2343_v51 = vsub.f32 %v4902_v14, %v2333_v50 }
 0x88c   : > { %v2347_v52 = vmul.f32 1.442695, %v2343_v51 }
 0x88d   : > { %v2336_v53 = vpop.xlane.xlu0 %2335 }
 0x88e   : > { %4269 = vpow2.f32 %v2347_v52  ;;  %v2344_v54 = vsub.f32 %v4909_v21, %v2336_v53 }
 0x890   : > { %v2349_v56 = vmul.f32 1.442695, %v2344_v54 }
 0x891   : > { %v2339_v57 = vpop.xlane.xlu0 %2338 }
 0x892   : > { %4271 = vpow2.f32 %v2349_v56  ;;  %v2345_v58 = vsub.f32 %v2249_v30, %v2339_v57 }
 0x894   : > { %v2351_v59 = vmul.f32 1.442695, %v2345_v58 }
 0x895   : > { %v2342_v62 = vpop.xlane.xlu1 %2341  ;;  %v1810_v21 = vpop.permute.xlu0 %1809 }
 0x896   : > { %4273 = vpow2.f32 %v2351_v59  ;;  %v2346_v0 = vsub.f32 %v2327_v33, %v2342_v62 }
 0x898   : > { %v4945_v2 = vpop.eup %4269  ;;  %v2353_v3 = vmul.f32 1.442695, %v2346_v0 }
 0x899   : > { %v1812_v7 = vpop.permute.xlu1 %1811  ;;  %v2355_v8 = vsel %vm475_vm2, %v4945_v2, 0.0  ;;  %v1134_v22 = vpop.permute.xlu0 %1133 }
 0x89a   : > { %4275 = vpow2.f32 %v2353_v3  ;;  %2356 = vadd.xlane.f32.xlu0 %v2355_v8  ;;  %v1822_v26 = vmul.f32 %v1812_v7, %v4897_v6  ;;  %v1145_v34 = vmul.f32 %v1134_v22, %v4857_v27 }
 0x89c   : > { %v4949_v10 = vpop.eup %4271 }
 0x89d   : > { %v1814_v11 = vpop.permute.xlu1 %1813  ;;  %v2358_v12 = vsel %vm475_vm2, %v4949_v10, 0.0  ;;  %v1138_v32 = vpop.permute.xlu0 %1137 }
 0x89e   : > { %2359 = vadd.xlane.f32.xlu1 %v2358_v12  ;;  %v1147_v35 = vmul.f32 %v1138_v32, %v4859_v29 }
 0x8a0   : > { %v4953_v13 = vpop.eup %4273 }
 0x8a1   : > { %v1816_v14 = vpop.permute.xlu1 %1815  ;;  %v2361_v15 = vsel %vm475_vm2, %v4953_v13, 0.0  ;;  %v2376_v36 = vpop.permute.xlu0 %2375 }
 0x8a2   : > { %2362 = vadd.xlane.f32.xlu0 %v2361_v15  ;;  %v1824_v33 = vmul.f32 %v1816_v14, %v4899_v9 }
 0x8a4   : > { %v4957_v16 = vpop.eup %4275 }
 0x8a5   : > { %v1136_v17 = vpop.permute.xlu1 %1135  ;;  %v2364_v18 = vsel %vm475_vm2, %v4957_v16, 0.0 }
 0x8a6   : > { %2365 = vadd.xlane.f32.xlu1 %v2364_v18  ;;  %v1146_v6 = vmul.f32 %v1136_v17, %v4819_v55 }
 0x8a9   : > { %v1140_v19 = vpop.permute.xlu1 %1139 }
 0x8aa   : > { %v1148_v9 = vmul.f32 %v1140_v19, %v4821_v61  ;;  %v470_v61 = vld [vmem:[#allocation7 + $0x10] sm:$0xff] }
 0x8ad   : > { %v2452_v20 = vpop.permute.xlu1 %2451 }
 0x8ae   : > { %4028 = vmatpush3.msra.mxu0 %v2452_v20 }
 0x8af   : > { %4037 = vmatprep.subr.mxu0 %v4464_v60 }
 0x8b7   : > { %2603 = vrot.lane.b32.xlu1 %v4738_v5, %s4475_s7 }
 0x8b8   : > { %2527 = vrot.lane.b32.xlu0 %v4735_v4, %s4475_s7  ;;  %s4481_s7 = smov [#allocation8]  }
 0x8bb   : > { %2681 = vrot.lane.b32.xlu1 %v4920_v44, %s4476_s8 }
 0x8bc   : > { %2679 = vrot.lane.b32.xlu0 %v4922_v45, %s4476_s8 }
 0x8bf   : > { %2683 = vrot.lane.b32.xlu1 %v4926_v46, %s4476_s8 }
 0x8c0   : > { %2798 = vrot.lane.b32.xlu0 %v4731_v1, %s4477_s12 }
 0x8c3   : > { %2685 = vrot.lane.b32.xlu1 %v4930_v47, %s4476_s8  ;;  %s4391_s8 = sshll.u32 %s4481_s7, 4  ;;  %s4392_s8 = int_to_ptr.vmem [resolvable:$false] %s4391_s8 }
 0x8c4   : > { %2796 = vrot.lane.b32.xlu0 %v4731_v1, %s4478_s24  ;;  %p4394_p7 = scmp.lt.s32.totalorder %s5081_s13, %s4392_s8 }
 0x8c7   : > { %2874 = vrot.lane.b32.xlu1 %v4729_v63, %s4478_s24 }
 0x8c8   : > { %2876 = vrot.lane.b32.xlu0 %v4729_v63, %s4477_s12 }
 0x8cb   : > { %3032 = vrot.lane.b32.xlu1 %v4738_v5, %s4477_s12 }
 0x8cc   : > { %2954 = vrot.lane.b32.xlu0 %v4735_v4, %s4477_s12  ;;  %s4393_s12 = scalar_lea.vmem %s4392_s8, 1024 }
 0x8cd   : > { %p4395_p9 = scmp.lt.s32.totalorder %s4393_s12, %s4387_s22 }
 0x8cf   : > { %3030 = vrot.lane.b32.xlu1 %v4738_v5, %s4478_s24  ;;  %p4396_p12 = por %p4395_p9, %p4394_p7 }
 0x8d0   : > { %2952 = vrot.lane.b32.xlu0 %v4735_v4, %s4478_s24 }
 0x8d1   : > { %p4397_p1 = pnand %p4396_p12, %p4390_p3 }
 0x8d2   : > { %v1577_v23 = vpop.f32.mrb[16].mxu1 }
 0x8d3   : > { %v1821_v24 = vmul.f32 %v1810_v21, %v1577_v23  ;;  %v3970_v25 = vpop.f32.mrb[17].mxu1 }
 0x8d5   : > { %3988 = vmatprep.mubr.msk.f32.mxu1 %vm475_vm2, %v1821_v24 }
 0x8d6   : > { %v1729_v28 = vpop.f32.mrb[18].mxu1  ;;  %3989 = vmatmul.mubr.msk.f32.vlgmr.msra.gmra.mrb[20].mxu1 %vm475_vm2, %v1822_v26 }
 0x8d7   : > { %v1823_v30 = vmul.f32 %v1814_v11, %v1729_v28  ;;  %v3980_v31 = vpop.f32.mrb[19].mxu1  ;;  %3995 = vmatpush3.msra.mxu1 %v4940_v49 }
 0x8d8   : > { %4022 = vmatprep.subr.mxu1 %v4464_v60 }
 0x8d9   : > { %3991 = vmatprep.mubr.msk.f32.mxu1 %vm475_vm2, %v1823_v30 }
 0x8da   : > { %3992 = vmatmul.mubr.msk.f32.gmra.mrb[22].mxu1 %vm475_vm2, %v1824_v33 }
 0x8db   : > { %3996 = vmatprep.mubr.msk.f32.mxu1 %vm475_vm2, %v1145_v34 }
 0x8de   : > { %3997 = vmatmul.mubr.msk.f32.vlgmr.msra.gmra.mrb[20].mxu1 %vm475_vm2, %v1146_v6 }
 0x8df   : > { %4023 = vmatpush3.msra.mxu1 %v2376_v36  ;;  %3999 = vmatprep.mubr.msk.f32.mxu1 %vm475_vm2, %v1147_v35 }
 0x8e0   : > { %4032 = vmatprep.subr.mxu1 %v4464_v60 }
 0x8e2   : > { %4000 = vmatmul.mubr.msk.f32.gmra.mrb[22].mxu1 %vm475_vm2, %v1148_v9 }
 0x8e3   : > { %4024 = vmatprep.mubr.msk.f32.mxu1 %vm4465_vm1, %v4464_v60 }
 0x927   : > { %v2357_v27 = vpop.xlane.xlu0 %2356 }
 0x928   : > { %4277 = vrcp.f32 %v2357_v27 }
 0x92b   : > { %v2360_v55 = vpop.xlane.xlu1 %2359 }
 0x92c   : > { %4279 = vrcp.f32 %v2360_v55 }
 0x92f   : > { %v2363_v29 = vpop.xlane.xlu0 %2362 }
 0x930   : > { %4281 = vrcp.f32 %v2363_v29 }
 0x932   : > { %v4278_v37 = vpop.eup %4277 }
 0x933   : > { %v2371_v38 = vmul.f32 %v4278_v37, %v4945_v2  ;;  %v2528_v39 = vpop.permute.xlu0 %2527  ;;  %v2366_v40 = vpop.xlane.xlu1 %2365 }
 0x934   : > { %4283 = vrcp.f32 %v2366_v40 }
 0x935   : > { %4025 = vmatmul.mubr.msk.f32.vlgmr.msra.gmra.mrb[24].mxu1 %vm475_vm2, %v2371_v38 }
 0x936   : > { %v4280_v41 = vpop.eup %4279  ;;  %4033 = vmatpush3.msra.mxu1 %v2528_v39  ;;  %4034 = vmatprep.mubr.msk.f32.mxu1 %vm4465_vm1, %v4464_v60 }
 0x937   : > { %v2372_v42 = vmul.f32 %v4280_v41, %v4949_v10  ;;  %v2680_v43 = vpop.permute.xlu0 %2679  ;;  %v2604_v48 = vpop.permute.xlu1 %2603  ;;  %4042 = vmatprep.subr.mxu1 %v470_v61 }
 0x939   : > { %4030 = vmatmul.mubr.msk.f32.vlgmr.msra.gmra.mrb[24].mxu0 %vm475_vm2, %v2372_v42 }
 0x93a   : > { %v4282_v49 = vpop.eup %4281  ;;  %4038 = vmatpush3.msra.mxu0 %v2604_v48  ;;  %4039 = vmatprep.mubr.msk.f32.mxu0 %vm4465_vm1, %v4464_v60 }
 0x93b   : > { %v2373_v50 = vmul.f32 %v4282_v49, %v4953_v13  ;;  %v2799_v51 = vpop.permute.xlu0 %2798  ;;  %v2682_v52 = vpop.permute.xlu1 %2681  ;;  %4050 = vmatprep.subr.mxu0 %v4464_v60 }
 0x93d   : > { %4035 = vmatmul.mubr.msk.f32.vlgmr.msra.gmra.mrb[26].mxu1 %vm475_vm2, %v2373_v50 }
 0x93e   : > { %v4284_v53 = vpop.eup %4283  ;;  %4043 = vmatpush3.msra.mxu1 %v470_v61 }
 0x93f   : > { %v2374_v54 = vmul.f32 %v4284_v53, %v4957_v16  ;;  %v2797_v56 = vpop.permute.xlu0 %2796  ;;  %v2684_v57 = vpop.permute.xlu1 %2683  ;;  %4060 = vmatprep.subr.mxu1 %v4464_v60 }
 0x941   : > { %4040 = vmatmul.mubr.msk.f32.vlgmr.msra.gmra.mrb[26].mxu0 %vm475_vm2, %v2374_v54 }
 0x942   : > { %4051 = vmatpush3.xpose.msk.msra.mxu0 %vm475_vm2, %v2799_v51  ;;  %4052 = vmatprep.mubr.msk.f32.mxu0 %vm4465_vm1, %v4464_v60 }
 0x943   : > { %v2877_v58 = vpop.permute.xlu0 %2876  ;;  %v2686_v59 = vpop.permute.xlu1 %2685  ;;  %4055 = vmatprep.subr.mxu0 %v4464_v60 }
 0x945   : > { %4053 = vmatmul.mubr.msk.f32.vlgmr.msra.gmra.mrb[28].mxu0 %vm475_vm2, %v2797_v56 }
 0x946   : > { %4056 = vmatpush3.xpose.msk.msra.mxu0 %vm475_vm2, %v2877_v58  ;;  %4057 = vmatprep.mubr.msk.f32.mxu0 %vm4465_vm1, %v4464_v60 }
 0x947   : > { %v2875_v62 = vpop.permute.xlu1 %2874  ;;  %4065 = vmatprep.subr.mxu0 %v4464_v60  ;;  %v2955_v13 = vpop.permute.xlu0 %2954 }
 0x949   : > { %4058 = vmatmul.mubr.msk.f32.vlgmr.msra.gmra.mrb[30].mxu0 %vm475_vm2, %v2875_v62 }
 0x94a   : > { %4067 = vmatprep.mubr.msk.f32.mxu0 %vm4465_vm1, %v4464_v60 }
 0x94b   : > { %v3033_v0 = vpop.permute.xlu1 %3032  ;;  %v2953_v23 = vpop.permute.xlu0 %2952 }
 0x94c   : > { %4066 = vmatpush3.xpose.msk.msra.mxu0 %vm475_vm2, %v3033_v0 }
 0x94d   : > { %4075 = vmatprep.subr.mxu0 %v4464_v60 }
 0x94f   : > { %v3031_v2 = vpop.permute.xlu1 %3030 }
 0x950   : > { %4068 = vmatmul.mubr.msk.f32.vlgmr.msra.gmra.mrb[32].mxu0 %vm475_vm2, %v3031_v2  ;;  %v471_v2 = vld [vmem:[#allocation7 + $0x18] sm:$0xff] }
 0x951   : > { %4077 = vmatprep.mubr.msk.f32.mxu0 %vm4465_vm1, %v4464_v60 }
 0xa08   : > { %v2447_v3 = vpop.f32.mrb[24].mxu1 }
 0xa09   : > { %v2691_v7 = vmul.f32 %v2680_v43, %v2447_v3  ;;  %v4026_v8 = vpop.f32.mrb[25].mxu1 }
 0xa0b   : > { %4044 = vmatprep.mubr.msk.f32.mxu1 %vm475_vm2, %v2691_v7 }
 0xa0c   : > { %v2523_v10 = vpop.f32.mrb[24].mxu0 }
 0xa0d   : > { %v2692_v11 = vmul.f32 %v2682_v52, %v2523_v10  ;;  %v4031_v12 = vpop.f32.mrb[25].mxu0 }
 0xa0f   : > { %4045 = vmatmul.mubr.msk.f32.vlgmr.msra.gmra.mrb[20].mxu1 %vm475_vm2, %v2692_v11 }
 0xa10   : > { %4061 = vmatpush3.xpose.msk.msra.mxu1 %vm475_vm2, %v2955_v13  ;;  %v2599_v14 = vpop.f32.mrb[26].mxu1 }
 0xa11   : > { %v2693_v15 = vmul.f32 %v2684_v57, %v2599_v14  ;;  %v4036_v16 = vpop.f32.mrb[27].mxu1  ;;  %4070 = vmatprep.subr.mxu1 %v4464_v60 }
 0xa13   : > { %4047 = vmatprep.mubr.msk.f32.mxu1 %vm475_vm2, %v2693_v15 }
 0xa14   : > { %v2675_v17 = vpop.f32.mrb[26].mxu0 }
 0xa15   : > { %v2694_v18 = vmul.f32 %v2686_v59, %v2675_v17  ;;  %v4041_v19 = vpop.f32.mrb[27].mxu0 }
 0xa17   : > { %4048 = vmatmul.mubr.msk.f32.gmra.mrb[22].mxu1 %vm475_vm2, %v2694_v18 }
 0xa18   : > { %v2870_v20 = vpop.f32.mrb[28].mxu0  ;;  %4062 = vmatprep.mubr.msk.f32.mxu1 %vm4465_vm1, %v4464_v60 }
 0xa19   : > { %v4054_v21 = vpop.f32.mrb[29].mxu0  ;;  %v3108_v22 = vsel %vm475_vm2, %v2870_v20, -inf }
 0xa1a   : > { %3109 = vmax.xlane.f32.xlu0 %v3108_v22  ;;  %v3780_v22 = vld [vmem:[%s5137_s4] ss:$0 sm:$0xff] }
 0xa1b   : > { %4063 = vmatmul.mubr.msk.f32.vlgmr.msra.gmra.mrb[28].mxu1 %vm475_vm2, %v2953_v23 }
 0xa1c   : > { %v2948_v24 = vpop.f32.mrb[30].mxu0  ;;  %4072 = vmatprep.mubr.msk.f32.mxu1 %vm4465_vm1, %v4464_v60 }
 0xa1d   : > { %v4059_v25 = vpop.f32.mrb[31].mxu0  ;;  %v3111_v26 = vsel %vm475_vm2, %v2948_v24, -inf }
 0xa1e   : > { %3112 = vmax.xlane.f32.xlu1 %v3111_v26 }
 0xa23   : > { %v3104_v28 = vpop.f32.mrb[32].mxu0 }
 0xa24   : > { %v4069_v30 = vpop.f32.mrb[33].mxu0  ;;  %v3117_v37 = vsel %vm475_vm2, %v3104_v28, -inf }
 0xaa7   : > { %v3110_v35 = vpop.xlane.xlu0 %3109 }
 0xaa8   : > { %v3120_v36 = vsub.f32 %v2870_v20, %v3110_v35 }
 0xaaa   : > { %v3124_v9 = vmul.f32 1.442695, %v3120_v36 }
 0xaab   : > { %v3113_v31 = vpop.xlane.xlu1 %3112 }
 0xaac   : > { %v3121_v32 = vsub.f32 %v2948_v24, %v3113_v31 }
 0xaae   : > { %v3126_v33 = vmul.f32 1.442695, %v3121_v32 }
 0xab0   : > { %4285 = vpow2.f32 %v3126_v33 }
 0xab1   : > { %4287 = vpow2.f32 %v3124_v9 }
 0xaba   : > { %v4286_v34 = vpop.eup %4285 }
 0xabb   : > { %v3135_v6 = vsel %vm475_vm2, %v4286_v34, 0.0  ;;  %v4288_v38 = vpop.eup %4287 }
 0xabc   : > { %3136 = vadd.xlane.f32.xlu1 %v3135_v6  ;;  %v3132_v39 = vsel %vm475_vm2, %v4288_v38, 0.0 }
 0xaee   : > { %v3026_v27 = vpop.f32.mrb[28].mxu1 }
 0xaef   : > { %v4064_v55 = vpop.f32.mrb[29].mxu1  ;;  %v3114_v29 = vsel %vm475_vm2, %v3026_v27, -inf }
 0xaf0   : > { %3115 = vmax.xlane.f32.xlu0 %v3114_v29 }
 0xaf4   : > { %3118 = vmax.xlane.f32.xlu0 %v3117_v37 }
 0xaf8   : > { %3133 = vadd.xlane.f32.xlu0 %v3132_v39 }
 0xb7d   : > { %v3116_v40 = vpop.xlane.xlu0 %3115 }
 0xb7e   : > { %v3122_v61 = vsub.f32 %v3026_v27, %v3116_v40 }
 0xb80   : > { %v3128_v41 = vmul.f32 1.442695, %v3122_v61 }
 0xb81   : > { %v3119_v42 = vpop.xlane.xlu0 %3118 }
 0xb82   : > { %4289 = vpow2.f32 %v3128_v41  ;;  %v3123_v43 = vsub.f32 %v3104_v28, %v3119_v42 }
 0xb84   : > { %v3130_v48 = vmul.f32 1.442695, %v3123_v43 }
 0xb86   : > { %4291 = vpow2.f32 %v3130_v48 }
 0xb8c   : > { %v4290_v49 = vpop.eup %4289 }
 0xb8d   : > { %v3138_v50 = vsel %vm475_vm2, %v4290_v49, 0.0 }
 0xb8e   : > { %3139 = vadd.xlane.f32.xlu0 %v3138_v50 }
 0xb90   : > { %v4292_v51 = vpop.eup %4291 }
 0xb91   : > { %v3141_v52 = vsel %vm475_vm2, %v4292_v51, 0.0 }
 0xb92   : > { %3142 = vadd.xlane.f32.xlu1 %v3141_v52 }
 0xba3   : > { %3228 = vrot.lane.b32.xlu1 %v4729_v63, %s4479_s26  ;;  %v3134_v63 = vpop.xlane.xlu0 %3133 }
 0xba4   : > { %3152 = vrot.lane.b32.xlu0 %v4731_v1, %s4479_s26  ;;  %4293 = vrcp.f32 %v3134_v63  ;;  %v3137_v1 = vpop.xlane.xlu1 %3136 }
 0xba5   : > { %4295 = vrcp.f32 %v3137_v1 }
 0xba7   : > { %3304 = vrot.lane.b32.xlu1 %v4735_v4, %s4479_s26 }
 0xba8   : > { %3456 = vrot.lane.b32.xlu0 %v4922_v45, %s4480_s15 }
 0xbab   : > { %3380 = vrot.lane.b32.xlu1 %v4738_v5, %s4479_s26 }
 0xbac   : > { %3460 = vrot.lane.b32.xlu0 %v4926_v46, %s4480_s15 }
 0xbae   : > { %v4294_v53 = vpop.eup %4293 }
 0xbaf   : > { %3458 = vrot.lane.b32.xlu1 %v4920_v44, %s4480_s15  ;;  %v3148_v54 = vmul.f32 %v4294_v53, %v4288_v38  ;;  %v4296_v5 = vpop.eup %4295 }
 0xbb0   : > { %v3149_v44 = vmul.f32 %v4296_v5, %v4286_v34 }
 0xbb3   : > { %3462 = vrot.lane.b32.xlu1 %v4930_v47, %s4480_s15 }
 0xc1b   : > { %v3140_v4 = vpop.xlane.xlu0 %3139 }
 0xc1c   : > { %4297 = vrcp.f32 %v3140_v4 }
 0xc1f   : > { %v3143_v45 = vpop.xlane.xlu1 %3142  ;;  %v3153_v56 = vpop.permute.xlu0 %3152 }
 0xc20   : > { %4299 = vrcp.f32 %v3143_v45  ;;  %4071 = vmatpush3.msra.mxu1 %v3153_v56 }
 0xc21   : > { %4073 = vmatmul.mubr.msk.f32.vlgmr.msra.gmra.mrb[30].mxu1 %vm475_vm2, %v3148_v54  ;;  %4080 = vmatprep.subr.mxu1 %v4464_v60 }
 0xc22   : > { %4082 = vmatprep.mubr.msk.f32.mxu1 %vm4465_vm1, %v4464_v60 }
 0xc23   : > { %v3229_v46 = vpop.permute.xlu1 %3228  ;;  %v3457_v3 = vpop.permute.xlu0 %3456 }
 0xc24   : > { %4076 = vmatpush3.msra.mxu0 %v3229_v46 }
 0xc25   : > { %4078 = vmatmul.mubr.msk.f32.vlgmr.msra.gmra.mrb[34].mxu0 %vm475_vm2, %v3149_v44  ;;  %4085 = vmatprep.subr.mxu0 %v4464_v60 }
 0xc26   : > { %v4298_v47 = vpop.eup %4297  ;;  %4087 = vmatprep.mubr.msk.f32.mxu0 %vm4465_vm1, %v4464_v60 }
 0xc27   : > { %v3150_v57 = vmul.f32 %v4298_v47, %v4290_v49  ;;  %v3305_v58 = vpop.permute.xlu1 %3304  ;;  %v3461_v14 = vpop.permute.xlu0 %3460 }
 0xc28   : > { %4081 = vmatpush3.msra.mxu1 %v3305_v58 }
 0xc29   : > { %4083 = vmatmul.mubr.msk.f32.vlgmr.msra.gmra.mrb[32].mxu1 %vm475_vm2, %v3150_v57  ;;  %4090 = vmatprep.subr.mxu1 %v471_v2 }
 0xc2a   : > { %v4300_v59 = vpop.eup %4299  ;;  %4091 = vmatpush3.msra.mxu1 %v471_v2 }
 0xc2b   : > { %v3151_v62 = vmul.f32 %v4300_v59, %v4292_v51  ;;  %v3381_v0 = vpop.permute.xlu1 %3380 }
 0xc2c   : > { %4086 = vmatpush3.msra.mxu0 %v3381_v0 }
 0xc2d   : > { %4088 = vmatmul.mubr.msk.f32.vlgmr.msra.gmra.mrb[36].mxu0 %vm475_vm2, %v3151_v62 }
 0xc2f   : > { %v3459_v60 = vpop.permute.xlu1 %3458 }
 0xc33   : > { %v3463_v18 = vpop.permute.xlu1 %3462 }
 0xcf4   : > { %v3224_v7 = vpop.f32.mrb[30].mxu1 }
 0xcf5   : > { %v3468_v8 = vmul.f32 %v3457_v3, %v3224_v7  ;;  %v4074_v10 = vpop.f32.mrb[31].mxu1 }
 0xcf7   : > { %4092 = vmatprep.mubr.msk.f32.mxu1 %vm475_vm2, %v3468_v8 }
 0xcf8   : > { %v3300_v11 = vpop.f32.mrb[34].mxu0 }
 0xcf9   : > { %v3469_v12 = vmul.f32 %v3459_v60, %v3300_v11  ;;  %v4079_v13 = vpop.f32.mrb[35].mxu0 }
 0xcfb   : > { %4093 = vmatmul.mubr.msk.f32.vlgmr.msra.gmra.mrb[20].mxu1 %vm475_vm2, %v3469_v12 }
 0xcfc   : > { %v3376_v15 = vpop.f32.mrb[32].mxu1 }
 0xcfd   : > { %v3470_v16 = vmul.f32 %v3461_v14, %v3376_v15  ;;  %v4084_v17 = vpop.f32.mrb[33].mxu1 }
 0xcff   : > { %4095 = vmatprep.mubr.msk.f32.mxu1 %vm475_vm2, %v3470_v16 }
 0xd00   : > { %v3452_v19 = vpop.f32.mrb[36].mxu0 }
 0xd01   : > { %v3471_v20 = vmul.f32 %v3463_v18, %v3452_v19  ;;  %v4089_v21 = vpop.f32.mrb[37].mxu0 }
 0xd03   : > { %4096 = vmatmul.mubr.msk.f32.gmra.mrb[22].mxu1 %vm475_vm2, %v3471_v20 }
 0xdce   : > { %v4094_v23 = vpop.f32.mrb[20].mxu1 }
 0xdcf   : > { %v3581_v24 = vadd.f32 %v4094_v23, %v3780_v22  ;;  %v3550_v25 = vpop.f32.mrb[21].mxu1 }
 0xdd0   : > { %v3580_v26 = vadd.f32 %v3780_v22, %v3550_v25 }
 0xdd1   : > { %3585 = vst.msk [vmem:[%s271_s28 + $0x8] sm:$0xff] %vm278_vm0, %v3581_v24 }
 0xdd2   : > { %3584 = vst.msk [vmem:[%s271_s28] sm:$0xff] %vm278_vm0, %v3580_v26 }
 0xdd6   : > { %v4097_v28 = vpop.f32.mrb[22].mxu1 }
 0xdd7   : > { %v3583_v30 = vadd.f32 %v4097_v28, %v3780_v22  ;;  %v3560_v31 = vpop.f32.mrb[23].mxu1 }
 0xdd8   : > { %v3582_v32 = vadd.f32 %v3780_v22, %v3560_v31 }
 0xdd9   : > { %3587 = vst.msk [vmem:[%s271_s28 + $0x18] sm:$0xff] %vm278_vm0, %v3583_v30 }
 0xdda   : > { %3586 = vst.msk [vmem:[%s271_s28 + $0x10] sm:$0xff] %vm278_vm0, %v3582_v32 }
 0xddb   : > { %4400 = shalt.err (!%p4397_p1)
}
 0xddc   : > { %s4401_s24 = scalar_lea.hbm %s5086_s6, 512  ;;  %s4405_s10 = scalar_lea.hbm %s5138_s5, 1024 }
 0xddd   : > { %p4402_p13 = scmp.ne.s32.totalorder %s5086_s6, %s4401_s24  ;;  %p4406_p4 = scmp.lt.u32.totalorder %s5086_s6, %s5138_s5 }
 0xdde   : > { %p4407_p5 = scmp.lt.u32.totalorder %s4405_s10, %s4401_s24  ;;  %p4409_p11 = scmp.lt.u32.totalorder %s4401_s24, %s5086_s6 }
 0xddf   : > { %p4403_p6 = pnand %p4402_p13, %p5152_p0 }
 0xde0   : > { %p4408_p8 = por %p4407_p5, %p4406_p4 }
 0xde1   : > { %p4404_p10 = pneg %p4403_p6 }
 0xde2   : > { %p4410_p2 = por %p4409_p11, %p4408_p8 }
 0xde4   : > { %p4411_p3 = pnand %p4410_p2, %p4404_p10 }
 0xde6   : > { %4414 = shalt.err (!%p4411_p3)
}
 0xde7   : > { %s4482_s30 = smov 128  }
 0xde8   : > { %4136 = dma.vmem_to_hbm [thread:$0]  (%p5152_p0), %s5081_s13, 512, %s5086_s6, %s3589_s17, %s4482_s30, %s4482_s30, %s4480_s15  }
 0xde9 PF: > { %s3617_s11 = sand.u32 1, %s4445_s18   ;;  %p5153_p7 = scmp.ne.s32.totalorder %s5143_s25, 0 }
 0xdea   : > { %p5154_p9 = scmp.ge.s32.totalorder %s4457_s21, 2  ;;  %s3618_s22 = scalar_lea.sflag [#allocation4], %s3617_s11 }
 0xdec   : > { %p4150_p12 = pnand %p5154_p9, %p5153_p7 }
 0xdee   : > { %4440 = dma.done.wait (!%p4150_p12), %s3618_s22, 512  }
 0xdef   : > { %4442 = vsyncadd (!%p4150_p12), %s3618_s22, 4294966784  ;;  %p19_p1 = scmp.ge.s32.totalorder %s4629_s29, 4   ;;  %s5155_s18 = smov %s4449_s19 }
 0xdf0   : > { %s5156_s19 = smov %s4453_s20  ;;  %s5157_s20 = smov %s4645_s27 }
 0xdf1   : > { %s5158_s21 = smov %s4629_s29  ;;  %21 = sbr.rel (!%p19_p1) target bundleno = 6 (0x6), region = 93 }
 0xdf8   :  { %3623 = vsyncpa [#allocation3], 1 }
 0xdf9   :  { %3625 = vsyncpa [#allocation3 + $0x1], 1 }
 0xdfa   :  { %3626 = vsyncpa [#allocation6], 1 }
 0xdfb   :  { %3627 = vsyncpa [#allocation4], 1 }
 0xdfc   :  { %3629 = vsyncpa [#allocation4 + $0x1], 1 }

</bundles_post_ra>
